<compile_context>
chip_gen: v7x
topology: tpu7x:2x2x1
jax: 0.10.0
libtpu: 0.0.40
codegen_flags: <defaults>
</compile_context>

<pallas_src>
import functools
import math

import jax
import jax.numpy as jnp
from jax import lax
from jax.experimental import pallas as pl
from jax.experimental.pallas import tpu as pltpu


def _round_up(v, m):
    return ((v + m - 1) // m) * m


def calc_length_jax(lengths, all_paddings, kernel_size, stride, ceil_mode,
                    repeat_num=1):
    """JAX port of NeMo's calc_length (mirrors torch's float-div semantics)."""
    add_pad = float(all_paddings - kernel_size)
    one = 1.0
    lengths = lengths.astype(jnp.float32)
    for _ in range(repeat_num):
        lengths = (lengths + add_pad) / float(stride) + one
        lengths = jnp.ceil(lengths) if ceil_mode else jnp.floor(lengths)
    return lengths.astype(jnp.int32)


# -----------------------------------------------------------------------------
# Generic fused matmul + bias (+ReLU), K-tiled with an f32 VMEM accumulator.
# Used for the stage-1 conv (as K=9 im2col) and for the output Linear.
# -----------------------------------------------------------------------------
def _mm_kernel(x_ref, w_ref, b_ref, o_ref, acc_ref, *, apply_relu):
    @pl.when(pl.program_id(2) == 0)
    def _init():
        acc_ref[...] = jnp.zeros_like(acc_ref)

    acc_ref[...] += jnp.dot(x_ref[...], w_ref[...],
                            preferred_element_type=jnp.float32)

    @pl.when(pl.program_id(2) == pl.num_programs(2) - 1)
    def _finalize():
        r = acc_ref[...] + b_ref[...]
        if apply_relu:
            r = jnp.maximum(r, 0.0)
        o_ref[...] = r.astype(o_ref.dtype)


def matmul_bias_act(x, w, b, *, relu, out_dtype, tm=256, tn=None,
                    max_full_k=4096, cast_bf16=True):
    """y = relu?(x @ w + b).  x: (M, K), w: (K, N), b: (N,) -> (M, N)."""
    M, K = x.shape
    K2, N = w.shape
    assert K == K2, (K, K2)

    # Lane-dense output: pad N up to a multiple of 128 (zero weight/bias cols).
    Np = _round_up(N, 128)
    if Np != N:
        w = jnp.pad(w, ((0, 0), (0, Np - N)))
        b = jnp.pad(b, ((0, Np - N),))
    if cast_bf16:
        x = x.astype(jnp.bfloat16)
        w = w.astype(jnp.bfloat16)
    b2 = b.reshape(1, Np).astype(jnp.float32)

    # N tile: full Np by default so the weight column index is constant and the
    # weight is DMA'd exactly once.
    tn_eff = Np if tn is None else min(_round_up(tn, 128), Np)

    # K tile: full K unless K is very large, then tile (pad K so blocks divide
    # evenly -- a ragged K block would feed garbage into the accumulation).
    if K <= max_full_k:
        tk_eff = K
    else:
        tk_eff = 2048
        Kp = _round_up(K, tk_eff)
        if Kp != K:
            x = jnp.pad(x, ((0, 0), (0, Kp - K)))
            w = jnp.pad(w, ((0, Kp - K), (0, 0)))
        K = Kp

    # M tile: either the full (possibly unaligned) dim, or a multiple of 16.
    tm_eff = M if M <= tm else tm
    gi = pl.cdiv(M, tm_eff)
    gj = pl.cdiv(Np, tn_eff)
    # v7x megacore: make sure both TensorCores get work when there is enough M.
    if gi == 1 and gj == 1 and M >= 32:
        tm_eff = _round_up(-(-M // 2), 16)
        gi = pl.cdiv(M, tm_eff)

    xi = jnp.dtype(x.dtype).itemsize
    wi = jnp.dtype(w.dtype).itemsize
    oi = jnp.dtype(out_dtype).itemsize

    def _est(t):
        return (2 * t * tk_eff * xi          # x blocks (double buffered)
                + 2 * tk_eff * tn_eff * wi   # weight blocks
                + 2 * tn_eff * 4             # bias
                + 2 * t * tn_eff * oi        # out blocks
                + t * tn_eff * 4)            # f32 accumulator scratch

    while _est(tm_eff) * 1.5 > 44 * 2**20 and tm_eff > 64:
        tm_eff = _round_up(tm_eff // 2, 16)
    gi = pl.cdiv(M, tm_eff)
    gk = pl.cdiv(K, tk_eff)
    vmem_limit = int(min(max(1.5 * _est(tm_eff), 16 * 2**20), 48 * 2**20))

    out = pl.pallas_call(
        functools.partial(_mm_kernel, apply_relu=relu),
        out_shape=jax.ShapeDtypeStruct((M, Np), out_dtype),
        grid_spec=pltpu.PrefetchScalarGridSpec(
            num_scalar_prefetch=0,
            grid=(gi, gj, gk),
            in_specs=[
                pl.BlockSpec((tm_eff, tk_eff), lambda i, j, k: (i, k)),
                pl.BlockSpec((tk_eff, tn_eff), lambda i, j, k: (k, j)),
                pl.BlockSpec((1, tn_eff), lambda i, j, k: (0, j)),
            ],
            out_specs=pl.BlockSpec((tm_eff, tn_eff), lambda i, j, k: (i, j)),
            scratch_shapes=[pltpu.VMEM((tm_eff, tn_eff), jnp.float32)],
        ),
        compiler_params=pltpu.CompilerParams(
            dimension_semantics=("parallel", "parallel", "arbitrary"),
            vmem_limit_bytes=vmem_limit,
        ),
    )(x, w, b2)

    if Np != N:
        out = out[:, :N]
    return out


# -----------------------------------------------------------------------------
# Stage-1 Conv2d(k=3, s=2, p=1) + ReLU (Cin = 1): tiny im2col (K=9) + MXU matmul
# with a large row tile; kept in f32 (essentially free at K=9).
# -----------------------------------------------------------------------------
def conv_stage1_relu(x_btf, w_hwio, bias, *, tm=2048):
    B, H, W = x_btf.shape
    Ho = (H - 1) // 2 + 1
    Wo = (W - 1) // 2 + 1
    cout = w_hwio.shape[-1]
    Cop = _round_up(cout, 128)

    xp = jnp.pad(x_btf, ((0, 0), (1, 1), (1, 1)))
    taps = [xp[:, kh:kh + 2 * Ho - 1:2, kw:kw + 2 * Wo - 1:2]
            for kh in range(3) for kw in range(3)]
    patches = jnp.stack(taps, axis=-1).reshape(B * Ho * Wo, 9)

    wmat = jnp.pad(w_hwio.reshape(9, cout), ((0, 0), (0, Cop - cout)))
    bvec = jnp.pad(bias, ((0, Cop - cout),))
    y = matmul_bias_act(patches, wmat, bvec, relu=True, out_dtype=jnp.bfloat16,
                        tm=tm, cast_bf16=False)
    return y.reshape(B, Ho, Wo, Cop)          # channels stay 128-padded


# -----------------------------------------------------------------------------
# Fused Conv2d(k=3, s=2, p=1) + ReLU for stages >= 2 (Cin a multiple of 128).
# Column ("kw") taps are folded into the contraction over column *pairs*
# (2*Cin wide); row ("kh") taps are unrolled inside the kernel.  Input prep is
# a compact ~1.5x restructure instead of the 9x im2col.
# -----------------------------------------------------------------------------
def _conv_pair_kernel(x_ref, wa_ref, wb_ref, b_ref, o_ref):
    th, wo, cop = o_ref.shape
    cp2 = x_ref.shape[-1]       # 2 * Cp
    cp = cp2 // 2
    acc = jnp.zeros((th * wo, cop), jnp.float32)
    for kh in range(3):
        # pair ow  : columns (2*ow, 2*ow+1)  -> taps kw=0, kw=1
        xa = x_ref[:, kh, 0:wo, :].reshape(th * wo, cp2)
        acc = acc + jnp.dot(xa, wa_ref[kh], preferred_element_type=jnp.float32)
        # pair ow+1: first element = column 2*ow+2 -> tap kw=2
        xb = x_ref[:, kh, 1:wo + 1, 0:cp].reshape(th * wo, cp)
        acc = acc + jnp.dot(xb, wb_ref[kh], preferred_element_type=jnp.float32)
    acc = jnp.maximum(acc + b_ref[...], 0.0)
    o_ref[...] = acc.reshape(th, wo, cop).astype(o_ref.dtype)


def conv_s2_relu_fused(x_nhwc, w_hwio, bias, *, rows_target=1024):
    B, H, W, Cp = x_nhwc.shape
    assert Cp % 128 == 0, Cp
    cin = w_hwio.shape[2]
    cout = w_hwio.shape[3]
    Cop = _round_up(cout, 128)
    Ho = (H - 1) // 2 + 1
    Wo = (W - 1) // 2 + 1

    # Weights: pair layout.  wa rows = [cin of kw=0 ; cin of kw=1], wb = kw=2.
    wp = jnp.pad(w_hwio, ((0, 0), (0, 0), (0, Cp - cin), (0, Cop - cout)))
    wa = jnp.concatenate([wp[:, 0], wp[:, 1]], axis=1).astype(jnp.bfloat16)
    wb = wp[:, 2].astype(jnp.bfloat16)
    bvec = jnp.pad(bias, ((0, Cop - cout),)).reshape(1, Cop).astype(jnp.float32)

    # Input: pad to (2*Ho+1) rows x 2*(Wo+1) cols, then stack the 3 kh row-taps
    # and fold column pairs into the channel axis.  ~1.5x the input in HBM.
    # TODO(synk): a zero-copy variant (pl.ANY input + manual halo DMA) would
    # remove even this restructure; left out to keep the lowering simple.
    pad_b = 2 * Ho + 1 - (H + 1)        # 0 or 1
    pad_r = 2 * Wo + 1 - W              # 1 or 2  -> padded width = 2*(Wo+1)
    xp = jnp.pad(x_nhwc, ((0, 0), (1, pad_b), (1, pad_r), (0, 0)))
    rows = [xp[:, kh:kh + 2 * Ho - 1:2] for kh in range(3)]
    xr = jnp.stack(rows, axis=2).reshape(B * Ho, 3, Wo + 1, 2 * Cp)
    xr = xr.astype(jnp.bfloat16)

    M = B * Ho
    th = max(1, min(M, rows_target // max(Wo, 1)))
    if pl.cdiv(M, th) < 2 and M >= 2:       # v7x megacore: >= 2 grid blocks
        th = -(-M // 2)

    def _est(t):
        return (2 * t * 3 * (Wo + 1) * 2 * Cp * 2       # x blocks (bf16)
                + 2 * 3 * (2 * Cp + Cp) * Cop * 2       # weights (bf16)
                + 2 * Cop * 4                           # bias
                + 2 * t * Wo * Cop * 2)                 # out blocks (bf16)

    while _est(th) * 1.5 > 44 * 2**20 and th > 1:
        th = -(-th // 2)
    vmem_limit = int(min(max(1.5 * _est(th), 16 * 2**20), 48 * 2**20))

    out = pl.pallas_call(
        _conv_pair_kernel,
        out_shape=jax.ShapeDtypeStruct((M, Wo, Cop), jnp.bfloat16),
        grid_spec=pltpu.PrefetchScalarGridSpec(
            num_scalar_prefetch=0,
            grid=(pl.cdiv(M, th),),
            in_specs=[
                pl.BlockSpec((th, 3, Wo + 1, 2 * Cp), lambda i: (i, 0, 0, 0)),
                pl.BlockSpec((3, 2 * Cp, Cop), lambda i: (0, 0, 0)),
                pl.BlockSpec((3, Cp, Cop), lambda i: (0, 0, 0)),
                pl.BlockSpec((1, Cop), lambda i: (0, 0)),
            ],
            out_specs=pl.BlockSpec((th, Wo, Cop), lambda i: (i, 0, 0)),
        ),
        compiler_params=pltpu.CompilerParams(
            dimension_semantics=("parallel",),
            vmem_limit_bytes=vmem_limit,
        ),
    )(xr, wa, wb, bvec)
    return out.reshape(B, Ho, Wo, Cop)


# -----------------------------------------------------------------------------
# ConvSubsampling.forward (subsampling="striding", non-causal)
# x: (B, T, feat_in) f32, lengths: (B,) int32.
# params: conv_w[i] (3,3,Cin,Cout) HWIO, conv_b[i] (Cout,),
#         out_w (conv_channels*freq_out, feat_out)  [torch out.weight.T],
#         out_b (feat_out,)
# -----------------------------------------------------------------------------
def conv_subsampling_forward(x, lengths, params, *, subsampling_factor):
    sampling_num = int(math.log2(subsampling_factor))
    new_lengths = calc_length_jax(lengths, all_paddings=2, kernel_size=3,
                                  stride=2, ceil_mode=False,
                                  repeat_num=sampling_num)
    conv_channels = params["conv_w"][0].shape[-1]

    h = conv_stage1_relu(x, params["conv_w"][0], params["conv_b"][0])
    for i in range(1, sampling_num):
        h = conv_s2_relu_fused(h, params["conv_w"][i], params["conv_b"][i])

    B, To, Fo, Cp = h.shape
    feat_out = params["out_w"].shape[-1]
    # torch feature order is c*Fo + f; fold that permutation (and the 128-pad
    # of the channel axis) into the Linear weight so `h` needs no transpose or
    # channel slice: row f*Cp + c of wl == out_w row c*Fo + f (zeros for c>=C).
    wl = params["out_w"].reshape(conv_channels, Fo, feat_out)
    wl = jnp.transpose(wl, (1, 0, 2))
    wl = jnp.pad(wl, ((0, 0), (0, Cp - conv_channels), (0, 0)))
    wl = wl.reshape(Fo * Cp, feat_out)

    y = matmul_bias_act(h.reshape(B * To, Fo * Cp), wl, params["out_b"],
                        relu=False, out_dtype=jnp.float32, tm=256)
    return y.reshape(B, To, feat_out), new_lengths


# -----------------------------------------------------------------------------
# Pure-JAX f32 reference (mirrors the PyTorch forward).
# -----------------------------------------------------------------------------
def _reference(x, lengths, params, *, subsampling_factor):
    sampling_num = int(math.log2(subsampling_factor))
    new_lengths = calc_length_jax(lengths, 2, 3, 2, False, sampling_num)
    h = x[:, None, :, :]                                  # (B, 1, T, F) NCHW
    for i in range(sampling_num):
        w = params["conv_w"][i]                           # (3, 3, Cin, Cout)
        b = params["conv_b"][i]
        h = lax.conv_general_dilated(
            h, w, window_strides=(2, 2), padding=((1, 1), (1, 1)),
            dimension_numbers=("NCHW", "HWIO", "NCHW"))
        h = jnp.maximum(h + b[None, :, None, None], 0.0)
    B, C, To, Fo = h.shape
    h = jnp.transpose(h, (0, 2, 1, 3)).reshape(B, To, C * Fo)
    y = h @ params["out_w"] + params["out_b"]
    return y, new_lengths


if __name__ == "__main__":
    # Small deterministic setup consistent with the module:
    #   subsampling="striding", subsampling_factor=4, feat_in=32, feat_out=64,
    #   conv_channels=32, non-causal.
    B, T = 2, 16
    feat_in, feat_out, conv_channels = 32, 64, 32
    subsampling_factor = 4
    sampling_num = int(math.log2(subsampling_factor))

    n_keys = 1 + 2 * sampling_num + 2
    keys = jax.random.split(jax.random.PRNGKey(0), n_keys)
    kx, keys = keys[0], list(keys[1:])

    x = jax.random.normal(kx, (B, T, feat_in), dtype=jnp.float32)
    lengths = jnp.array([16, 11], dtype=jnp.int32)

    conv_w, conv_b = [], []
    cin = 1
    for i in range(sampling_num):
        fan_in = cin * 9
        bound = 1.0 / math.sqrt(fan_in)                   # torch Conv2d init
        conv_w.append(jax.random.uniform(keys.pop(0), (3, 3, cin, conv_channels),
                                         jnp.float32, -bound, bound))
        conv_b.append(jax.random.uniform(keys.pop(0), (conv_channels,),
                                         jnp.float32, -bound, bound))
        cin = conv_channels

    freq_out = feat_in
    for _ in range(sampling_num):
        freq_out = (freq_out + 2 - 3) // 2 + 1
    k_lin = conv_channels * freq_out
    bound = 1.0 / math.sqrt(k_lin)                        # torch Linear init
    out_w = jax.random.uniform(keys.pop(0), (k_lin, feat_out),
                               jnp.float32, -bound, bound)
    out_b = jax.random.uniform(keys.pop(0), (feat_out,),
                               jnp.float32, -bound, bound)

    params = {"conv_w": conv_w, "conv_b": conv_b, "out_w": out_w, "out_b": out_b}

    fwd = jax.jit(functools.partial(conv_subsampling_forward,
                                    subsampling_factor=subsampling_factor))
    y, out_lens = fwd(x, lengths, params)
    y = jax.block_until_ready(y)
    out_lens = jax.block_until_ready(out_lens)

    y_ref, lens_ref = _reference(x, lengths, params,
                                 subsampling_factor=subsampling_factor)

    # bf16 MXU inputs for stage >= 2 and the Linear => loosened tolerance.
    ok = bool(jnp.allclose(y, y_ref, atol=2e-2, rtol=5e-2))
    ok &= bool(jnp.array_equal(out_lens, lens_ref))

    if ok:
        print("KERNEL_OK")
    else:
        print("max_abs_err =", float(jnp.max(jnp.abs(y - y_ref))))
</pallas_src>

<mosaic_0001>
module attributes {stable_mosaic.version = 11 : i64} {
  func.func @_mm_kernel(%arg0: i32, %arg1: i32, %arg2: i32, %arg3: memref<128x9xf32, #tpu.memory_space<vmem>>, %arg4: memref<9x128xf32, #tpu.memory_space<vmem>>, %arg5: memref<1x128xf32, #tpu.memory_space<vmem>>, %arg6: memref<128x128xbf16, #tpu.memory_space<vmem>>, %arg7: memref<128x128xf32, #tpu.memory_space<vmem>>) attributes {dimension_semantics = [#tpu.dimension_semantics<parallel>, #tpu.dimension_semantics<parallel>, #tpu.dimension_semantics<arbitrary>], iteration_bounds = array<i64: 2, 1, 1>, scalar_prefetch = 0 : i64, scratch_operands = 1 : i64, tpu.core_type = #tpu.core_type<tc>, window_params = [{transform_indices = @transform_0, window_bounds = array<i64: 128, 9>}, {transform_indices = @transform_1, window_bounds = array<i64: 9, 128>}, {transform_indices = @transform_2, window_bounds = array<i64: 1, 128>}, {transform_indices = @transform_3, window_bounds = array<i64: 128, 128>}]} {
    %c0_i32 = arith.constant 0 : i32
    %0 = arith.cmpi eq, %arg2, %c0_i32 : i32
    %1 = arith.extui %0 : i1 to i32
    %c0_i32_0 = arith.constant 0 : i32
    %2 = arith.cmpi ne, %1, %c0_i32_0 : i32
    scf.if %2 {
      %cst_10 = arith.constant 0.000000e+00 : f32
      %12 = vector.broadcast %cst_10 : f32 to vector<128x128xf32>
      %c0_11 = arith.constant 0 : index
      %c0_12 = arith.constant 0 : index
      %13 = vector.load %arg7[%c0_11, %c0_12] : memref<128x128xf32, #tpu.memory_space<vmem>>, vector<128x128xf32>
      tpu.vector_store %arg7[%c0_11, %c0_12], %12 {strides = array<i32>} : memref<128x128xf32, #tpu.memory_space<vmem>>, vector<128x128xf32>,
    } else {
    }
    %c0 = arith.constant 0 : index
    %c0_1 = arith.constant 0 : index
    %3 = vector.load %arg7[%c0, %c0_1] : memref<128x128xf32, #tpu.memory_space<vmem>>, vector<128x128xf32>
    %c0_2 = arith.constant 0 : index
    %c0_3 = arith.constant 0 : index
    %4 = vector.load %arg3[%c0_2, %c0_3] : memref<128x9xf32, #tpu.memory_space<vmem>>, vector<128x9xf32>
    %c0_4 = arith.constant 0 : index
    %c0_5 = arith.constant 0 : index
    %5 = vector.load %arg4[%c0_4, %c0_5] : memref<9x128xf32, #tpu.memory_space<vmem>>, vector<9x128xf32>
    %cst = arith.constant dense<0.000000e+00> : vector<128x128xf32>
    %6 = tpu.matmul %4, %5, %cst {dimension_numbers = #tpu.dot_dimension_numbers<[1], [0], [0], [1], [0, 0, 1, 1], [], []>} : vector<128x9xf32>, vector<9x128xf32>, vector<128x128xf32> -> vector<128x128xf32>
    %7 = arith.addf %3, %6 : vector<128x128xf32>
    %c0_6 = arith.constant 0 : index
    %c0_7 = arith.constant 0 : index
    %8 = vector.load %arg7[%c0_6, %c0_7] : memref<128x128xf32, #tpu.memory_space<vmem>>, vector<128x128xf32>
    tpu.vector_store %arg7[%c0_6, %c0_7], %7 {strides = array<i32>} : memref<128x128xf32, #tpu.memory_space<vmem>>, vector<128x128xf32>,
    %c0_i32_8 = arith.constant 0 : i32
    %9 = arith.cmpi eq, %arg2, %c0_i32_8 : i32
    %10 = arith.extui %9 : i1 to i32
    %c0_i32_9 = arith.constant 0 : i32
    %11 = arith.cmpi ne, %10, %c0_i32_9 : i32
    scf.if %11 {
      %c0_10 = arith.constant 0 : index
      %c0_11 = arith.constant 0 : index
      %12 = vector.load %arg7[%c0_10, %c0_11] : memref<128x128xf32, #tpu.memory_space<vmem>>, vector<128x128xf32>
      %c0_12 = arith.constant 0 : index
      %c0_13 = arith.constant 0 : index
      %13 = vector.load %arg5[%c0_12, %c0_13] : memref<1x128xf32, #tpu.memory_space<vmem>>, vector<1x128xf32>
      %14 = vector.broadcast %13 : vector<1x128xf32> to vector<128x128xf32>
      %15 = arith.addf %12, %14 : vector<128x128xf32>
      %cst_14 = arith.constant 0.000000e+00 : f32
      %16 = vector.broadcast %cst_14 : f32 to vector<128x128xf32>
      %17 = arith.maximumf %15, %16 : vector<128x128xf32>
      %18 = arith.truncf %17 : vector<128x128xf32> to vector<128x128xbf16>
      %c0_15 = arith.constant 0 : index
      %c0_16 = arith.constant 0 : index
      %19 = vector.load %arg6[%c0_15, %c0_16] : memref<128x128xbf16, #tpu.memory_space<vmem>>, vector<128x128xbf16>
      tpu.vector_store %arg6[%c0_15, %c0_16], %18 {strides = array<i32>} : memref<128x128xbf16, #tpu.memory_space<vmem>>, vector<128x128xbf16>,
    } else {
    }
    return
  }
  func.func @transform_0(%arg0: i32, %arg1: i32, %arg2: i32) -> (i32, i32) {
    %c0_i32 = arith.constant 0 : i32
    return %arg0, %arg2 : i32, i32
  }
  func.func @transform_1(%arg0: i32, %arg1: i32, %arg2: i32) -> (i32, i32) {
    %c0_i32 = arith.constant 0 : i32
    return %arg2, %arg1 : i32, i32
  }
  func.func @transform_2(%arg0: i32, %arg1: i32, %arg2: i32) -> (i32, i32) {
    %c0_i32 = arith.constant 0 : i32
    %c0_i32_0 = arith.constant 0 : i32
    return %c0_i32, %arg1 : i32, i32
  }
  func.func @transform_3(%arg0: i32, %arg1: i32, %arg2: i32) -> (i32, i32) {
    %c0_i32 = arith.constant 0 : i32
    return %arg0, %arg1 : i32, i32
  }
}

module attributes {stable_mosaic.version = 11 : i64} {
  func.func @_conv_pair_kernel(%arg0: i32, %arg1: memref<4x3x9x256xbf16, #tpu.memory_space<vmem>>, %arg2: memref<3x256x128xbf16, #tpu.memory_space<vmem>>, %arg3: memref<3x128x128xbf16, #tpu.memory_space<vmem>>, %arg4: memref<1x128xf32, #tpu.memory_space<vmem>>, %arg5: memref<4x8x128xbf16, #tpu.memory_space<vmem>>) attributes {dimension_semantics = [#tpu.dimension_semantics<parallel>], iteration_bounds = array<i64: 2>, scalar_prefetch = 0 : i64, scratch_operands = 0 : i64, tpu.core_type = #tpu.core_type<tc>, window_params = [{transform_indices = @transform_0, window_bounds = array<i64: 4, 3, 9, 256>}, {pipeline_mode = #tpu.pipeline_mode<synchronous>, transform_indices = @transform_1, window_bounds = array<i64: 3, 256, 128>}, {pipeline_mode = #tpu.pipeline_mode<synchronous>, transform_indices = @transform_2, window_bounds = array<i64: 3, 128, 128>}, {pipeline_mode = #tpu.pipeline_mode<synchronous>, transform_indices = @transform_3, window_bounds = array<i64: 1, 128>}, {transform_indices = @transform_4, window_bounds = array<i64: 4, 8, 128>}]} {
    %cst = arith.constant 0.000000e+00 : f32
    %0 = vector.broadcast %cst : f32 to vector<32x128xf32>
    %c0 = arith.constant 0 : index
    %c0_0 = arith.constant 0 : index
    %c0_1 = arith.constant 0 : index
    %c0_2 = arith.constant 0 : index
    %1 = vector.load %arg1[%c0, %c0_0, %c0_1, %c0_2] : memref<4x3x9x256xbf16, #tpu.memory_space<vmem>>, vector<4x1x8x256xbf16>
    %2 = vector.shape_cast %1 : vector<4x1x8x256xbf16> to vector<4x8x256xbf16>
    %3 = vector.shape_cast %2 : vector<4x8x256xbf16> to vector<32x256xbf16>
    %c0_3 = arith.constant 0 : index
    %c0_4 = arith.constant 0 : index
    %c0_5 = arith.constant 0 : index
    %4 = vector.load %arg2[%c0_3, %c0_4, %c0_5] : memref<3x256x128xbf16, #tpu.memory_space<vmem>>, vector<1x256x128xbf16>
    %5 = vector.shape_cast %4 : vector<1x256x128xbf16> to vector<256x128xbf16>
    %cst_6 = arith.constant dense<0.000000e+00> : vector<32x128xf32>
    %6 = tpu.matmul %3, %5, %cst_6 {dimension_numbers = #tpu.dot_dimension_numbers<[1], [0], [0], [1], [0, 0, 1, 1], [], []>} : vector<32x256xbf16>, vector<256x128xbf16>, vector<32x128xf32> -> vector<32x128xf32>
    %7 = arith.addf %0, %6 : vector<32x128xf32>
    %c0_7 = arith.constant 0 : index
    %c0_8 = arith.constant 0 : index
    %c1 = arith.constant 1 : index
    %c0_9 = arith.constant 0 : index
    %8 = vector.load %arg1[%c0_7, %c0_8, %c1, %c0_9] : memref<4x3x9x256xbf16, #tpu.memory_space<vmem>>, vector<4x1x8x128xbf16>
    %9 = vector.shape_cast %8 : vector<4x1x8x128xbf16> to vector<4x8x128xbf16>
    %10 = vector.shape_cast %9 : vector<4x8x128xbf16> to vector<32x128xbf16>
    %c0_10 = arith.constant 0 : index
    %c0_11 = arith.constant 0 : index
    %c0_12 = arith.constant 0 : index
    %11 = vector.load %arg3[%c0_10, %c0_11, %c0_12] : memref<3x128x128xbf16, #tpu.memory_space<vmem>>, vector<1x128x128xbf16>
    %12 = vector.shape_cast %11 : vector<1x128x128xbf16> to vector<128x128xbf16>
    %cst_13 = arith.constant dense<0.000000e+00> : vector<32x128xf32>
    %13 = tpu.matmul %10, %12, %cst_13 {dimension_numbers = #tpu.dot_dimension_numbers<[1], [0], [0], [1], [0, 0, 1, 1], [], []>} : vector<32x128xbf16>, vector<128x128xbf16>, vector<32x128xf32> -> vector<32x128xf32>
    %14 = arith.addf %7, %13 : vector<32x128xf32>
    %c0_14 = arith.constant 0 : index
    %c1_15 = arith.constant 1 : index
    %c0_16 = arith.constant 0 : index
    %c0_17 = arith.constant 0 : index
    %15 = vector.load %arg1[%c0_14, %c1_15, %c0_16, %c0_17] : memref<4x3x9x256xbf16, #tpu.memory_space<vmem>>, vector<4x1x8x256xbf16>
    %16 = vector.shape_cast %15 : vector<4x1x8x256xbf16> to vector<4x8x256xbf16>
    %17 = vector.shape_cast %16 : vector<4x8x256xbf16> to vector<32x256xbf16>
    %c1_18 = arith.constant 1 : index
    %c0_19 = arith.constant 0 : index
    %c0_20 = arith.constant 0 : index
    %18 = vector.load %arg2[%c1_18, %c0_19, %c0_20] : memref<3x256x128xbf16, #tpu.memory_space<vmem>>, vector<1x256x128xbf16>
    %19 = vector.shape_cast %18 : vector<1x256x128xbf16> to vector<256x128xbf16>
    %cst_21 = arith.constant dense<0.000000e+00> : vector<32x128xf32>
    %20 = tpu.matmul %17, %19, %cst_21 {dimension_numbers = #tpu.dot_dimension_numbers<[1], [0], [0], [1], [0, 0, 1, 1], [], []>} : vector<32x256xbf16>, vector<256x128xbf16>, vector<32x128xf32> -> vector<32x128xf32>
    %21 = arith.addf %14, %20 : vector<32x128xf32>
    %c0_22 = arith.constant 0 : index
    %c1_23 = arith.constant 1 : index
    %c1_24 = arith.constant 1 : index
    %c0_25 = arith.constant 0 : index
    %22 = vector.load %arg1[%c0_22, %c1_23, %c1_24, %c0_25] : memref<4x3x9x256xbf16, #tpu.memory_space<vmem>>, vector<4x1x8x128xbf16>
    %23 = vector.shape_cast %22 : vector<4x1x8x128xbf16> to vector<4x8x128xbf16>
    %24 = vector.shape_cast %23 : vector<4x8x128xbf16> to vector<32x128xbf16>
    %c1_26 = arith.constant 1 : index
    %c0_27 = arith.constant 0 : index
    %c0_28 = arith.constant 0 : index
    %25 = vector.load %arg3[%c1_26, %c0_27, %c0_28] : memref<3x128x128xbf16, #tpu.memory_space<vmem>>, vector<1x128x128xbf16>
    %26 = vector.shape_cast %25 : vector<1x128x128xbf16> to vector<128x128xbf16>
    %cst_29 = arith.constant dense<0.000000e+00> : vector<32x128xf32>
    %27 = tpu.matmul %24, %26, %cst_29 {dimension_numbers = #tpu.dot_dimension_numbers<[1], [0], [0], [1], [0, 0, 1, 1], [], []>} : vector<32x128xbf16>, vector<128x128xbf16>, vector<32x128xf32> -> vector<32x128xf32>
    %28 = arith.addf %21, %27 : vector<32x128xf32>
    %c0_30 = arith.constant 0 : index
    %c2 = arith.constant 2 : index
    %c0_31 = arith.constant 0 : index
    %c0_32 = arith.constant 0 : index
    %29 = vector.load %arg1[%c0_30, %c2, %c0_31, %c0_32] : memref<4x3x9x256xbf16, #tpu.memory_space<vmem>>, vector<4x1x8x256xbf16>
    %30 = vector.shape_cast %29 : vector<4x1x8x256xbf16> to vector<4x8x256xbf16>
    %31 = vector.shape_cast %30 : vector<4x8x256xbf16> to vector<32x256xbf16>
    %c2_33 = arith.constant 2 : index
    %c0_34 = arith.constant 0 : index
    %c0_35 = arith.constant 0 : index
    %32 = vector.load %arg2[%c2_33, %c0_34, %c0_35] : memref<3x256x128xbf16, #tpu.memory_space<vmem>>, vector<1x256x128xbf16>
    %33 = vector.shape_cast %32 : vector<1x256x128xbf16> to vector<256x128xbf16>
    %cst_36 = arith.constant dense<0.000000e+00> : vector<32x128xf32>
    %34 = tpu.matmul %31, %33, %cst_36 {dimension_numbers = #tpu.dot_dimension_numbers<[1], [0], [0], [1], [0, 0, 1, 1], [], []>} : vector<32x256xbf16>, vector<256x128xbf16>, vector<32x128xf32> -> vector<32x128xf32>
    %35 = arith.addf %28, %34 : vector<32x128xf32>
    %c0_37 = arith.constant 0 : index
    %c2_38 = arith.constant 2 : index
    %c1_39 = arith.constant 1 : index
    %c0_40 = arith.constant 0 : index
    %36 = vector.load %arg1[%c0_37, %c2_38, %c1_39, %c0_40] : memref<4x3x9x256xbf16, #tpu.memory_space<vmem>>, vector<4x1x8x128xbf16>
    %37 = vector.shape_cast %36 : vector<4x1x8x128xbf16> to vector<4x8x128xbf16>
    %38 = vector.shape_cast %37 : vector<4x8x128xbf16> to vector<32x128xbf16>
    %c2_41 = arith.constant 2 : index
    %c0_42 = arith.constant 0 : index
    %c0_43 = arith.constant 0 : index
    %39 = vector.load %arg3[%c2_41, %c0_42, %c0_43] : memref<3x128x128xbf16, #tpu.memory_space<vmem>>, vector<1x128x128xbf16>
    %40 = vector.shape_cast %39 : vector<1x128x128xbf16> to vector<128x128xbf16>
    %cst_44 = arith.constant dense<0.000000e+00> : vector<32x128xf32>
    %41 = tpu.matmul %38, %40, %cst_44 {dimension_numbers = #tpu.dot_dimension_numbers<[1], [0], [0], [1], [0, 0, 1, 1], [], []>} : vector<32x128xbf16>, vector<128x128xbf16>, vector<32x128xf32> -> vector<32x128xf32>
    %42 = arith.addf %35, %41 : vector<32x128xf32>
    %c0_45 = arith.constant 0 : index
    %c0_46 = arith.constant 0 : index
    %43 = vector.load %arg4[%c0_45, %c0_46] : memref<1x128xf32, #tpu.memory_space<vmem>>, vector<1x128xf32>
    %44 = vector.broadcast %43 : vector<1x128xf32> to vector<32x128xf32>
    %45 = arith.addf %42, %44 : vector<32x128xf32>
    %cst_47 = arith.constant 0.000000e+00 : f32
    %46 = vector.broadcast %cst_47 : f32 to vector<32x128xf32>
    %47 = arith.maximumf %45, %46 : vector<32x128xf32>
    %48 = vector.shape_cast %47 : vector<32x128xf32> to vector<4x8x128xf32>
    %49 = arith.truncf %48 : vector<4x8x128xf32> to vector<4x8x128xbf16>
    %c0_48 = arith.constant 0 : index
    %c0_49 = arith.constant 0 : index
    %c0_50 = arith.constant 0 : index
    %50 = vector.load %arg5[%c0_48, %c0_49, %c0_50] : memref<4x8x128xbf16, #tpu.memory_space<vmem>>, vector<4x8x128xbf16>
    tpu.vector_store %arg5[%c0_48, %c0_49, %c0_50], %49 {strides = array<i32>} : memref<4x8x128xbf16, #tpu.memory_space<vmem>>, vector<4x8x128xbf16>,
    return
  }
  func.func @transform_0(%arg0: i32) -> (i32, i32, i32, i32) {
    %c0_i32 = arith.constant 0 : i32
    %c0_i32_0 = arith.constant 0 : i32
    %c0_i32_1 = arith.constant 0 : i32
    %c0_i32_2 = arith.constant 0 : i32
    return %arg0, %c0_i32, %c0_i32_0, %c0_i32_1 : i32, i32, i32, i32
  }
  func.func @transform_1(%arg0: i32) -> (i32, i32, i32) {
    %c0_i32 = arith.constant 0 : i32
    %c0_i32_0 = arith.constant 0 : i32
    %c0_i32_1 = arith.constant 0 : i32
    %c0_i32_2 = arith.constant 0 : i32
    return %c0_i32, %c0_i32_0, %c0_i32_1 : i32, i32, i32
  }
  func.func @transform_2(%arg0: i32) -> (i32, i32, i32) {
    %c0_i32 = arith.constant 0 : i32
    %c0_i32_0 = arith.constant 0 : i32
    %c0_i32_1 = arith.constant 0 : i32
    %c0_i32_2 = arith.constant 0 : i32
    return %c0_i32, %c0_i32_0, %c0_i32_1 : i32, i32, i32
  }
  func.func @transform_3(%arg0: i32) -> (i32, i32) {
    %c0_i32 = arith.constant 0 : i32
    %c0_i32_0 = arith.constant 0 : i32
    %c0_i32_1 = arith.constant 0 : i32
    return %c0_i32, %c0_i32_0 : i32, i32
  }
  func.func @transform_4(%arg0: i32) -> (i32, i32, i32) {
    %c0_i32 = arith.constant 0 : i32
    %c0_i32_0 = arith.constant 0 : i32
    %c0_i32_1 = arith.constant 0 : i32
    return %arg0, %c0_i32, %c0_i32_0 : i32, i32, i32
  }
}

module attributes {stable_mosaic.version = 11 : i64} {
  func.func @_mm_kernel(%arg0: i32, %arg1: i32, %arg2: i32, %arg3: memref<8x1024xbf16, #tpu.memory_space<vmem>>, %arg4: memref<1024x128xbf16, #tpu.memory_space<vmem>>, %arg5: memref<1x128xf32, #tpu.memory_space<vmem>>, %arg6: memref<8x128xf32, #tpu.memory_space<vmem>>, %arg7: memref<8x128xf32, #tpu.memory_space<vmem>>) attributes {dimension_semantics = [#tpu.dimension_semantics<parallel>, #tpu.dimension_semantics<parallel>, #tpu.dimension_semantics<arbitrary>], iteration_bounds = array<i64: 1, 1, 1>, scalar_prefetch = 0 : i64, scratch_operands = 1 : i64, tpu.core_type = #tpu.core_type<tc>, window_params = [{transform_indices = @transform_0, window_bounds = array<i64: 8, 1024>}, {transform_indices = @transform_1, window_bounds = array<i64: 1024, 128>}, {transform_indices = @transform_2, window_bounds = array<i64: 1, 128>}, {transform_indices = @transform_3, window_bounds = array<i64: 8, 128>}]} {
    %c0_i32 = arith.constant 0 : i32
    %0 = arith.cmpi eq, %arg2, %c0_i32 : i32
    %1 = arith.extui %0 : i1 to i32
    %c0_i32_0 = arith.constant 0 : i32
    %2 = arith.cmpi ne, %1, %c0_i32_0 : i32
    scf.if %2 {
      %cst_10 = arith.constant 0.000000e+00 : f32
      %12 = vector.broadcast %cst_10 : f32 to vector<8x128xf32>
      %c0_11 = arith.constant 0 : index
      %c0_12 = arith.constant 0 : index
      %13 = vector.load %arg7[%c0_11, %c0_12] : memref<8x128xf32, #tpu.memory_space<vmem>>, vector<8x128xf32>
      tpu.vector_store %arg7[%c0_11, %c0_12], %12 {strides = array<i32>} : memref<8x128xf32, #tpu.memory_space<vmem>>, vector<8x128xf32>,
    } else {
    }
    %c0 = arith.constant 0 : index
    %c0_1 = arith.constant 0 : index
    %3 = vector.load %arg7[%c0, %c0_1] : memref<8x128xf32, #tpu.memory_space<vmem>>, vector<8x128xf32>
    %c0_2 = arith.constant 0 : index
    %c0_3 = arith.constant 0 : index
    %4 = vector.load %arg3[%c0_2, %c0_3] : memref<8x1024xbf16, #tpu.memory_space<vmem>>, vector<8x1024xbf16>
    %c0_4 = arith.constant 0 : index
    %c0_5 = arith.constant 0 : index
    %5 = vector.load %arg4[%c0_4, %c0_5] : memref<1024x128xbf16, #tpu.memory_space<vmem>>, vector<1024x128xbf16>
    %cst = arith.constant dense<0.000000e+00> : vector<8x128xf32>
    %6 = tpu.matmul %4, %5, %cst {dimension_numbers = #tpu.dot_dimension_numbers<[1], [0], [0], [1], [0, 0, 1, 1], [], []>} : vector<8x1024xbf16>, vector<1024x128xbf16>, vector<8x128xf32> -> vector<8x128xf32>
    %7 = arith.addf %3, %6 : vector<8x128xf32>
    %c0_6 = arith.constant 0 : index
    %c0_7 = arith.constant 0 : index
    %8 = vector.load %arg7[%c0_6, %c0_7] : memref<8x128xf32, #tpu.memory_space<vmem>>, vector<8x128xf32>
    tpu.vector_store %arg7[%c0_6, %c0_7], %7 {strides = array<i32>} : memref<8x128xf32, #tpu.memory_space<vmem>>, vector<8x128xf32>,
    %c0_i32_8 = arith.constant 0 : i32
    %9 = arith.cmpi eq, %arg2, %c0_i32_8 : i32
    %10 = arith.extui %9 : i1 to i32
    %c0_i32_9 = arith.constant 0 : i32
    %11 = arith.cmpi ne, %10, %c0_i32_9 : i32
    scf.if %11 {
      %c0_10 = arith.constant 0 : index
      %c0_11 = arith.constant 0 : index
      %12 = vector.load %arg7[%c0_10, %c0_11] : memref<8x128xf32, #tpu.memory_space<vmem>>, vector<8x128xf32>
      %c0_12 = arith.constant 0 : index
      %c0_13 = arith.constant 0 : index
      %13 = vector.load %arg5[%c0_12, %c0_13] : memref<1x128xf32, #tpu.memory_space<vmem>>, vector<1x128xf32>
      %14 = vector.broadcast %13 : vector<1x128xf32> to vector<8x128xf32>
      %15 = arith.addf %12, %14 : vector<8x128xf32>
      %c0_14 = arith.constant 0 : index
      %c0_15 = arith.constant 0 : index
      %16 = vector.load %arg6[%c0_14, %c0_15] : memref<8x128xf32, #tpu.memory_space<vmem>>, vector<8x128xf32>
      tpu.vector_store %arg6[%c0_14, %c0_15], %15 {strides = array<i32>} : memref<8x128xf32, #tpu.memory_space<vmem>>, vector<8x128xf32>,
    } else {
    }
    return
  }
  func.func @transform_0(%arg0: i32, %arg1: i32, %arg2: i32) -> (i32, i32) {
    %c0_i32 = arith.constant 0 : i32
    return %arg0, %arg2 : i32, i32
  }
  func.func @transform_1(%arg0: i32, %arg1: i32, %arg2: i32) -> (i32, i32) {
    %c0_i32 = arith.constant 0 : i32
    return %arg2, %arg1 : i32, i32
  }
  func.func @transform_2(%arg0: i32, %arg1: i32, %arg2: i32) -> (i32, i32) {
    %c0_i32 = arith.constant 0 : i32
    %c0_i32_0 = arith.constant 0 : i32
    return %c0_i32, %arg1 : i32, i32
  }
  func.func @transform_3(%arg0: i32, %arg1: i32, %arg2: i32) -> (i32, i32) {
    %c0_i32 = arith.constant 0 : i32
    return %arg0, %arg1 : i32, i32
  }
}

</mosaic_0001>

<bundles_post_ra>
// kernel: conv_subsampling_forward.3
= control target key start
LH: loop header
LB: loop body
LE: loop exit
PB: predicated region body
PF: predicated region fallthrough
CT: control target
= control target key end

     0   :  { %s1026_s12 = smov 0   ;;  %s1028_s13 = smov 0   ;;  %s1098_s0 = inlined_call_operand.vmem [shape: f32[256,9], index: 0, kind: input, shape index: {}]   ;;  %s1099_s1 = inlined_call_operand.vmem [shape: f32[9,128], index: 1, kind: input, shape index: {}]   ;;  %s1100_s2 = inlined_call_operand.vmem [shape: f32[1,128], index: 2, kind: input, shape index: {}]   ;;  %s1101_s3 = inlined_call_operand.vmem [shape: bf16[256,128], index: 3, kind: output, shape index: {}]  }
   0x1   :  { %s1030_s14 = smov 0  }
   0x2 LB: > { %s32_s15 = sadd.s32 1, %s999_s13  ;;  %p798_p0 = scmp.ge.s32.totalorder %s1003_s14, 1  ;;  %s1003_s14 = sphi %s1030_s14, %s13_s14   ;;  %s999_s13 = sphi %s1028_s13, %s1103_s13   ;;  %s995_s12 = sphi %s1026_s12, %s1102_s12  }
   0x3   : > { %p34_p1 = scmp.ge.s32.totalorder %s32_s15, 2  ;;  %p188_p2 = scmp.lt.s32.totalorder %s1003_s14, 3 }
   0x5   : > { %s1105_s15 = smov (%p34_p1, %s32_s15), 0  ;;  %p189_p3 = pnand %p798_p0, %p188_p2 }
   0x6   : > { %v311_v0 = vld [vmem:[%s1099_s1] sm:$0xff] (!%p189_p3)  ;;  %v312_v1 = vld [vmem:[%s1099_s1 + $0x8] sm:$0x1] (!%p189_p3)  ;;  %vm362_vm0 = vcmask (!%p189_p3), 1040384   ;;  %s799_s20 = sshll.u32 (!%p189_p3), %s995_s12, 4  ;;  %vm1005_vm1 = vmmov (!%p189_p3), 1  }
   0x7   : > { %192 = sbr.rel (%p189_p3) target bundleno = 252 (0xfc), region = 32  ;;  %v948_v2 = vpack.c.bf16 (!%p189_p3), %v312_v1, %v311_v0  ;;  %vm949_vm2 = vmpackc.low (!%p189_p3), %vm362_vm0, %vm1005_vm1  ;;  %p230_p4 = scmp.lt.s32.totalorder (!%p189_p3), %s799_s20, 31  ;;  %vm313_vm3 = vcmask (!%p189_p3), 72704   ;;  %v820_v19 = vld [vmem:[%s1100_s2] ss:$0 sm:$0xff] (!%p189_p3) }
   0x9   : > { %950 = vmatprep.subr.msk.bf16.mxu0 (!%p189_p3), %vm949_vm2, %v948_v2  ;;  %954 = vmatprep.subr.msk.bf16.mxu1 (!%p189_p3), %vm949_vm2, %v948_v2 }
   0xa   : > { %953 = vmatpush3.bf16.msk.msra.mxu0 (!%p189_p3), %vm949_vm2, %v948_v2  ;;  %955 = vmatpush3.bf16.msk.msra.mxu1 (!%p189_p3), %vm949_vm2, %v948_v2 }
   0xe   : > { %s1107_s20 = smov (!%p230_p4, %s799_s20), 31 }
   0xf   : > { %s800_s21 = sshll.u32 %s1107_s20, 3  ;;  %s802_s27 = sshll.u32 %s1107_s20, 2 }
  0x10   : > { %s236_s24 = scalar_lea.vmem %s1098_s0, %s800_s21  ;;  %s1079_s30 = scalar_lea.vmem %s1101_s3, %s802_s27 }
  0x11   : > { %v295_v3 = vld [vmem:[%s236_s24] sm:$0xff]  ;;  %v296_v5 = vld [vmem:[%s236_s24 + $0x8] sm:$0xff]  ;;  %v297_v7 = vld [vmem:[%s236_s24 + $0x10] sm:$0xff] }
  0x12   : > { %v303_v4 = vld [vmem:[%s236_s24 + $0x40] sm:$0xff]  ;;  %924 = vmatprep.mubr.msk.f32.mxu0 %vm313_vm3, %v295_v3  ;;  %v304_v6 = vld [vmem:[%s236_s24 + $0x48] sm:$0xff]  ;;  %v305_v8 = vld [vmem:[%s236_s24 + $0x50] sm:$0xff] }
  0x13   : > { %936 = vmatprep.mubr.msk.f32.mxu1 %vm313_vm3, %v303_v4  ;;  %925 = vmatmul.mubr.msk.f32.vlgmr.msra.gmra.mrb[0].mxu0 %vm313_vm3, %v296_v5  ;;  %v298_v9 = vld [vmem:[%s236_s24 + $0x18] sm:$0xff]  ;;  %v299_v11 = vld [vmem:[%s236_s24 + $0x20] sm:$0xff]  ;;  %v300_v13 = vld [vmem:[%s236_s24 + $0x28] sm:$0xff] }
  0x14   : > { %937 = vmatmul.mubr.msk.f32.vlgmr.msra.gmra.mrb[0].mxu1 %vm313_vm3, %v304_v6  ;;  %927 = vmatprep.mubr.msk.f32.mxu0 %vm313_vm3, %v297_v7  ;;  %v306_v10 = vld [vmem:[%s236_s24 + $0x58] sm:$0xff]  ;;  %v307_v12 = vld [vmem:[%s236_s24 + $0x60] sm:$0xff]  ;;  %v308_v14 = vld [vmem:[%s236_s24 + $0x68] sm:$0xff] }
  0x15   : > { %939 = vmatprep.mubr.msk.f32.mxu1 %vm313_vm3, %v305_v8  ;;  %v301_v15 = vld [vmem:[%s236_s24 + $0x30] sm:$0xff]  ;;  %v302_v17 = vld [vmem:[%s236_s24 + $0x38] sm:$0xff] }
  0x16   : > { %v309_v16 = vld [vmem:[%s236_s24 + $0x70] sm:$0xff]  ;;  %v310_v18 = vld [vmem:[%s236_s24 + $0x78] sm:$0xff] }
  0x17   : > { %928 = vmatmul.mubr.msk.f32.gmra.mrb[2].mxu0 %vm313_vm3, %v298_v9 }
  0x18   : > { %940 = vmatmul.mubr.msk.f32.gmra.mrb[2].mxu1 %vm313_vm3, %v306_v10  ;;  %930 = vmatprep.mubr.msk.f32.mxu0 %vm313_vm3, %v299_v11 }
  0x19   : > { %942 = vmatprep.mubr.msk.f32.mxu1 %vm313_vm3, %v307_v12 }
  0x1b   : > { %931 = vmatmul.mubr.msk.f32.gmra.mrb[4].mxu0 %vm313_vm3, %v300_v13 }
  0x1c   : > { %943 = vmatmul.mubr.msk.f32.gmra.mrb[4].mxu1 %vm313_vm3, %v308_v14  ;;  %933 = vmatprep.mubr.msk.f32.mxu0 %vm313_vm3, %v301_v15 }
  0x1d   : > { %945 = vmatprep.mubr.msk.f32.mxu1 %vm313_vm3, %v309_v16 }
  0x1f   : > { %934 = vmatmul.mubr.msk.f32.gmra.mrb[6].mxu0 %vm313_vm3, %v302_v17 }
  0x20   : > { %946 = vmatmul.mubr.msk.f32.gmra.mrb[6].mxu1 %vm313_vm3, %v310_v18 }
  0xe6   : > { %v926_v20 = vpop.f32.mrb[0].mxu0 }
  0xe7   : > { %v938_v21 = vpop.f32.mrb[0].mxu1  ;;  %v570_v22 = vadd.f32 %v926_v20, %v820_v19  ;;  %v432_v24 = vpop.f32.mrb[1].mxu0 }
  0xe8   : > { %v578_v23 = vadd.f32 %v938_v21, %v820_v19  ;;  %v472_v25 = vpop.f32.mrb[1].mxu1  ;;  %v569_v26 = vadd.f32 %v820_v19, %v432_v24 }
  0xe9   : > { %v577_v27 = vadd.f32 %v820_v19, %v472_v25  ;;  %v586_v28 = vmax.f32 %v570_v22, 0.0 }
  0xea   : > { %v594_v29 = vmax.f32 %v578_v23, 0.0  ;;  %v585_v30 = vmax.f32 %v569_v26, 0.0  ;;  %v929_v32 = vpop.f32.mrb[2].mxu0 }
  0xeb   : > { %v593_v31 = vmax.f32 %v577_v27, 0.0  ;;  %v941_v33 = vpop.f32.mrb[2].mxu1  ;;  %v572_v34 = vadd.f32 %v929_v32, %v820_v19  ;;  %v442_v36 = vpop.f32.mrb[3].mxu0 }
  0xec   : > { %v580_v35 = vadd.f32 %v941_v33, %v820_v19  ;;  %v482_v37 = vpop.f32.mrb[3].mxu1  ;;  %v858_v38 = vpack.c.bf16 %v586_v28, %v585_v30  ;;  %v571_v40 = vadd.f32 %v820_v19, %v442_v36 }
  0xed   : > { %v878_v39 = vpack.c.bf16 %v594_v29, %v593_v31  ;;  %v579_v41 = vadd.f32 %v820_v19, %v482_v37  ;;  %v588_v42 = vmax.f32 %v572_v34, 0.0 }
  0xee   : > { %v596_v43 = vmax.f32 %v580_v35, 0.0  ;;  %859 = vst [vmem:[%s1079_s30] sm:$0xff] %v858_v38   ;;  %v587_v44 = vmax.f32 %v571_v40, 0.0  ;;  %v932_v46 = vpop.f32.mrb[4].mxu0 }
  0xef   : > { %898 = vst [vmem:[%s1079_s30 + $0x20] sm:$0xff] %v878_v39   ;;  %v595_v45 = vmax.f32 %v579_v41, 0.0  ;;  %v944_v47 = vpop.f32.mrb[4].mxu1  ;;  %v574_v48 = vadd.f32 %v932_v46, %v820_v19  ;;  %v452_v50 = vpop.f32.mrb[5].mxu0 }
  0xf0   : > { %v582_v49 = vadd.f32 %v944_v47, %v820_v19  ;;  %v492_v51 = vpop.f32.mrb[5].mxu1  ;;  %v863_v52 = vpack.c.bf16 %v588_v42, %v587_v44  ;;  %v573_v54 = vadd.f32 %v820_v19, %v452_v50 }
  0xf1   : > { %v883_v53 = vpack.c.bf16 %v596_v43, %v595_v45  ;;  %v581_v55 = vadd.f32 %v820_v19, %v492_v51  ;;  %v590_v56 = vmax.f32 %v574_v48, 0.0 }
  0xf2   : > { %v598_v57 = vmax.f32 %v582_v49, 0.0  ;;  %895 = vst [vmem:[%s1079_s30 + $0x8] sm:$0xff] %v863_v52   ;;  %v589_v58 = vmax.f32 %v573_v54, 0.0  ;;  %v935_v60 = vpop.f32.mrb[6].mxu0 }
  0xf3   : > { %899 = vst [vmem:[%s1079_s30 + $0x28] sm:$0xff] %v883_v53   ;;  %v597_v59 = vmax.f32 %v581_v55, 0.0  ;;  %v947_v61 = vpop.f32.mrb[6].mxu1  ;;  %v576_v62 = vadd.f32 %v935_v60, %v820_v19  ;;  %v462_v0 = vpop.f32.mrb[7].mxu0 }
  0xf4   : > { %v584_v63 = vadd.f32 %v947_v61, %v820_v19  ;;  %v502_v1 = vpop.f32.mrb[7].mxu1  ;;  %v868_v2 = vpack.c.bf16 %v590_v56, %v589_v58  ;;  %v575_v4 = vadd.f32 %v820_v19, %v462_v0 }
  0xf5   : > { %v888_v3 = vpack.c.bf16 %v598_v57, %v597_v59  ;;  %v583_v5 = vadd.f32 %v820_v19, %v502_v1  ;;  %v592_v6 = vmax.f32 %v576_v62, 0.0 }
  0xf6   : > { %v600_v7 = vmax.f32 %v584_v63, 0.0  ;;  %896 = vst [vmem:[%s1079_s30 + $0x10] sm:$0xff] %v868_v2   ;;  %v591_v8 = vmax.f32 %v575_v4, 0.0 }
  0xf7   : > { %900 = vst [vmem:[%s1079_s30 + $0x30] sm:$0xff] %v888_v3   ;;  %v599_v9 = vmax.f32 %v583_v5, 0.0 }
  0xf8   : > { %v873_v10 = vpack.c.bf16 %v592_v6, %v591_v8 }
  0xf9   : > { %v893_v11 = vpack.c.bf16 %v600_v7, %v599_v9 }
  0xfa   : > { %897 = vst [vmem:[%s1079_s30 + $0x18] sm:$0xff] %v873_v10  }
  0xfb   : > { %901 = vst [vmem:[%s1079_s30 + $0x38] sm:$0xff] %v893_v11  }
  0xfc PF: > { %s13_s14 = sadd.s32 1, %s1003_s14   ;;  %s1102_s12 = smov %s999_s13 }
  0xfd   : > { %p10_p5 = scmp.ge.s32.totalorder %s13_s14, 4   ;;  %s1103_s13 = smov %s1105_s15 }
  0xff   :  { %12 = sbr.rel (!%p10_p5) target bundleno = 2 (0x2), region = 76 }

// kernel: conv_subsampling_forward.4
= control target key start
LH: loop header
LB: loop body
LE: loop exit
PB: predicated region body
PF: predicated region fallthrough
CT: control target
= control target key end

     0   :  { %s2026_s15 = smov 0   ;;  %s2334_s0 = inlined_call_operand.vmem [shape: bf16[8,3,9,256], index: 0, kind: input, shape index: {}]   ;;  %s2335_s1 = inlined_call_operand.vmem [shape: bf16[3,256,128], index: 1, kind: input, shape index: {}]   ;;  %s2336_s2 = inlined_call_operand.vmem [shape: bf16[3,128,128], index: 2, kind: input, shape index: {}]   ;;  %s2337_s3 = inlined_call_operand.vmem [shape: f32[1,128], index: 3, kind: input, shape index: {}]   ;;  %s2338_s4 = inlined_call_operand.vmem [shape: bf16[8,8,128], index: 4, kind: output, shape index: {}]  }
   0x1 LB: > { %s1467_s16 = sadd.s32 4294967295, %s1999_s15   ;;  %p1471_p0 = scmp.ge.s32.totalorder %s1999_s15, 1  ;;  %s1999_s15 = sphi %s2026_s15, %s14_s15  }
   0x2   : > { %p164_p1 = scmp.lt.s32.totalorder %s1999_s15, 3 }
   0x4   : > { %p165_p2 = pnand %p1471_p0, %p164_p1 }
   0x5   : > { %v1903_v0 = vld [vmem:[%s2336_s2] sm:$0xff] (!%p165_p2)   ;;  %v1906_v3 = vld [vmem:[%s2336_s2 + $0x8] sm:$0xff] (!%p165_p2)   ;;  %v1909_v6 = vld [vmem:[%s2336_s2 + $0x10] sm:$0xff] (!%p165_p2)   ;;  %s1472_s5 = sshll.u32 (!%p165_p2), %s1467_s16, 2  ;;  %vm249_vm0 = vsmask.f32 (!%p165_p2), 3328 }
   0x6   : > { %168 = sbr.rel (%p165_p2) target bundleno = 330 (0x14a), region = 36  ;;  %v1904_v1 = vld [vmem:[%s2335_s1 + $0x40] sm:$0xff] (!%p165_p2)   ;;  %1814 = vmatprep.subr.bf16.mxu0 (!%p165_p2), %v1903_v0  ;;  %v1907_v4 = vld [vmem:[%s2335_s1 + $0x48] sm:$0xff] (!%p165_p2)   ;;  %v1910_v7 = vld [vmem:[%s2335_s1 + $0x50] sm:$0xff] (!%p165_p2)   ;;  %p192_p3 = scmp.lt.s32.totalorder (!%p165_p2), %s1472_s5, 7 }
   0x7   : > { %v1905_v2 = vld [vmem:[%s2335_s1] sm:$0xff] (!%p165_p2)   ;;  %1815 = vmatpush3.bf16.msra.mxu0 (!%p165_p2), %v1903_v0  ;;  %1710 = vmatprep.subr.bf16.mxu1 (!%p165_p2), %v1904_v1  ;;  %v1908_v5 = vld [vmem:[%s2335_s1 + $0x8] sm:$0xff] (!%p165_p2)   ;;  %v1911_v8 = vld [vmem:[%s2335_s1 + $0x10] sm:$0xff] (!%p165_p2)   ;;  %vm250_vm1 = vsmask.f32 (!%p165_p2), 7440 }
   0x8   : > { %1711 = vmatpush3.bf16.msra.mxu1 (!%p165_p2), %v1905_v2  ;;  %1816 = vmatprep.subr.bf16.mxu0 (!%p165_p2), %v1906_v3  ;;  %v1912_v9 = vld [vmem:[%s2336_s2 + $0x18] sm:$0xff] (!%p165_p2)   ;;  %v1915_v12 = vld [vmem:[%s2336_s2 + $0x20] sm:$0xff] (!%p165_p2)   ;;  %v1918_v15 = vld [vmem:[%s2336_s2 + $0x28] sm:$0xff] (!%p165_p2)  }
   0x9   : > { %1712 = vmatprep.subr.bf16.mxu1 (!%p165_p2), %v1907_v4  ;;  %v1913_v10 = vld [vmem:[%s2335_s1 + $0x58] sm:$0xff] (!%p165_p2)   ;;  %v1916_v13 = vld [vmem:[%s2335_s1 + $0x60] sm:$0xff] (!%p165_p2)   ;;  %v1919_v16 = vld [vmem:[%s2335_s1 + $0x68] sm:$0xff] (!%p165_p2)  }
   0xa   : > { %v1914_v11 = vld [vmem:[%s2335_s1 + $0x18] sm:$0xff] (!%p165_p2)   ;;  %v1917_v14 = vld [vmem:[%s2335_s1 + $0x20] sm:$0xff] (!%p165_p2)   ;;  %v1920_v17 = vld [vmem:[%s2335_s1 + $0x28] sm:$0xff] (!%p165_p2)  }
   0xb   : > { %1817 = vmatpush3.bf16.msra.mxu0 (!%p165_p2), %v1906_v3  ;;  %v1921_v18 = vld [vmem:[%s2336_s2 + $0x30] sm:$0xff] (!%p165_p2)   ;;  %v1924_v21 = vld [vmem:[%s2336_s2 + $0x38] sm:$0xff] (!%p165_p2)   ;;  %v1927_v34 = vld [vmem:[%s2335_s1 + $0xc0] sm:$0xff] (!%p165_p2)  }
   0xc   : > { %1713 = vmatpush3.bf16.msra.mxu1 (!%p165_p2), %v1908_v5  ;;  %1818 = vmatprep.subr.bf16.mxu0 (!%p165_p2), %v1909_v6  ;;  %v1922_v19 = vld [vmem:[%s2335_s1 + $0x70] sm:$0xff] (!%p165_p2)   ;;  %v1925_v22 = vld [vmem:[%s2335_s1 + $0x78] sm:$0xff] (!%p165_p2)   ;;  %vm2127_vm2 = vmor (!%p165_p2), %vm249_vm0, %vm250_vm1 }
   0xd   : > { %1714 = vmatprep.subr.bf16.mxu1 %v1910_v7  ;;  %s2342_s5 = smov (!%p192_p3, %s1472_s5), 7  ;;  %v1923_v20 = vld [vmem:[%s2335_s1 + $0x30] sm:$0xff]   ;;  %v1926_v27 = vld [vmem:[%s2335_s1 + $0x38] sm:$0xff]   ;;  %v1932_v4 = vld [vmem:[%s2335_s1 + $0x140] sm:$0xff]  }
   0xe   : > { %s1894_s27 = smul.u32 48, %s2342_s5  ;;  %v1933_v7 = vld [vmem:[%s2335_s1 + $0x100] sm:$0xff]   ;;  %s1475_s26 = sshll.u32 %s2342_s5, 2 }
   0xf   : > { %1819 = vmatpush3.bf16.msra.mxu0 %v1909_v6  ;;  %s202_s29 = scalar_lea.vmem %s2338_s4, %s1475_s26 }
  0x10   : > { %1715 = vmatpush3.bf16.msra.mxu1 %v1911_v8  ;;  %1820 = vmatprep.subr.bf16.mxu0 %v1912_v9  ;;  %s2100_s11 = scalar_lea.vmem %s2334_s0, %s1894_s27 }
  0x11   : > { %1716 = vmatprep.subr.bf16.mxu1 %v1913_v10  ;;  %v241_v23 = vld [vmem:[%s2100_s11] sm:$0xf]  ;;  %v242_v24 = vld [vmem:[%s2100_s11 + $0x8] sm:$0x1]  ;;  %v243_v25 = vld [vmem:[%s2100_s11 + $0x30] sm:$0xf] }
  0x12   : > { %v244_v26 = vld [vmem:[%s2100_s11 + $0x38] sm:$0x1]  ;;  %v253_v28 = vshrl.u32 %v241_v23, 16  ;;  %v256_v29 = vshll.u32 %v241_v23, 16  ;;  %v262_v30 = vshll.u32 %v242_v24, 16  ;;  %v267_v31 = vshrl.u32 %v243_v25, 16 }
  0x13   : > { %1821 = vmatpush3.bf16.msra.mxu0 %v1912_v9  ;;  %v270_v32 = vshll.u32 %v243_v25, 16  ;;  %v276_v33 = vshll.u32 %v244_v26, 16  ;;  %v245_v39 = vld [vmem:[%s2100_s11 + $0x60] sm:$0xf]  ;;  %v246_v42 = vld [vmem:[%s2100_s11 + $0x68] sm:$0x1] }
  0x14   : > { %1717 = vmatpush3.bf16.msra.mxu1 %v1914_v11  ;;  %1822 = vmatprep.subr.bf16.mxu0 %v1915_v12  ;;  %v255_v35 = vrot.slane %v253_v28, 4  ;;  %v258_v36 = vrot.slane %v256_v29, 5  ;;  %v264_v37 = vrot.slane %v262_v30, 5  ;;  %v269_v38 = vrot.slane %v267_v31, 4  ;;  %v247_v43 = vld [vmem:[%s2100_s11 + $0x90] sm:$0xf] }
  0x15   : > { %1718 = vmatprep.subr.bf16.mxu1 %v1916_v13  ;;  %v272_v40 = vrot.slane %v270_v32, 5  ;;  %v278_v41 = vrot.slane %v276_v33, 5  ;;  %v248_v45 = vld [vmem:[%s2100_s11 + $0x98] sm:$0x1]  ;;  %v281_v46 = vshrl.u32 %v245_v39, 16  ;;  %v284_v47 = vshll.u32 %v245_v39, 16 }
  0x16   : > { %v259_v44 = vor.u32 %v258_v36, %v255_v35  ;;  %v290_v48 = vshll.u32 %v246_v42, 16  ;;  %v295_v51 = vshrl.u32 %v247_v43, 16  ;;  %v298_v52 = vshll.u32 %v247_v43, 16  ;;  %v1928_v54 = vld [vmem:[%s2100_s11] ss:$48 sps:$4 sm:$0xff]   ;;  %v1934_v11 = vld [vmem:[%s2335_s1 + $0xc8] sm:$0xff]  }
  0x17   : > { %1823 = vmatpush3.bf16.msra.mxu0 %v1915_v12  ;;  %v273_v50 = vor.u32 %v272_v40, %v269_v38  ;;  %v304_v53 = vshll.u32 %v248_v45, 16  ;;  %v283_v56 = vrot.slane %v281_v46, 4  ;;  %v286_v57 = vrot.slane %v284_v47, 5  ;;  %v1930_v58 = vld [vmem:[%s2100_s11 + $0x4] ss:$48 sps:$4 sm:$0xff]   ;;  %v1936_v13 = vld [vmem:[%s2335_s1 + $0x148] sm:$0xff]  }
  0x18   : > { %1719 = vmatpush3.bf16.msra.mxu1 %v1917_v14  ;;  %1824 = vmatprep.subr.bf16.mxu0 %v1918_v15  ;;  %v260_v55 = vrot.slane %v259_v44, 4  ;;  %v292_v60 = vrot.slane %v290_v48, 5  ;;  %v297_v61 = vrot.slane %v295_v51, 4  ;;  %v300_v62 = vrot.slane %v298_v52, 5  ;;  %v1931_v9 = vld [vmem:[%s2335_s1 + $0x80] sm:$0xff]   ;;  %v1945_v23 = vld [vmem:[%s2335_s1 + $0x118] sm:$0xff]  }
  0x19   : > { %1720 = vmatprep.subr.bf16.mxu1 %v1919_v16  ;;  %v274_v59 = vrot.slane %v273_v50, 4  ;;  %v287_v0 = vor.u32 %v286_v57, %v283_v56  ;;  %577 = vmatprep.mubr.bf16.mxu1 %v1930_v58  ;;  %v306_v3 = vrot.slane %v304_v53, 5  ;;  %v1935_v16 = vld [vmem:[%s2335_s1 + $0x88] sm:$0xff]   ;;  %v1943_v24 = vld [vmem:[%s2335_s1 + $0x98] sm:$0xff]   ;;  %v1946_v25 = vld [vmem:[%s2335_s1 + $0xe0] sm:$0xff]  }
  0x1a   : > { %v265_v63 = vsel %vm2127_vm2, %v260_v55, %v264_v37  ;;  %v301_v2 = vor.u32 %v300_v62, %v297_v61  ;;  %v1948_v26 = vld [vmem:[%s2335_s1 + $0x160] sm:$0xff]   ;;  %v1950_v29 = vld [vmem:[%s2335_s1 + $0xe8] sm:$0xff]   ;;  %v1958_v35 = vld [vmem:[%s2335_s1 + $0x170] sm:$0xff]  }
  0x1b   : > { %1825 = vmatpush3.bf16.msra.mxu0 %v1918_v15  ;;  %v279_v1 = vsel %vm2127_vm2, %v274_v59, %v278_v41  ;;  %v288_v6 = vrot.slane %v287_v0, 4  ;;  %v1937_v15 = vld [vmem:[%s2335_s1 + $0x108] sm:$0xff]   ;;  %v1947_v28 = vld [vmem:[%s2335_s1 + $0xa0] sm:$0xff]   ;;  %v1960_v37 = vld [vmem:[%s2335_s1 + $0x130] sm:$0xff]  }
  0x1c   : > { %1721 = vmatpush3.bf16.msra.mxu1 %v1920_v17  ;;  %1826 = vmatprep.subr.bf16.mxu0 %v1921_v18  ;;  %v1476_v5 = vcombine.low %v265_v63, %v279_v1  ;;  %v302_v8 = vrot.slane %v301_v2, 4  ;;  %v1938_v17 = vld [vmem:[%s2335_s1 + $0xd0] sm:$0xff]   ;;  %v1952_v30 = vld [vmem:[%s2335_s1 + $0x168] sm:$0xff]   ;;  %v1961_v39 = vld [vmem:[%s2335_s1 + $0xf8] sm:$0xff]  }
  0x1d   : > { %1722 = vmatprep.subr.bf16.mxu1 %v1922_v19  ;;  %v293_v10 = vsel %vm2127_vm2, %v288_v6, %v292_v60  ;;  %v1941_v19 = vld [vmem:[%s2335_s1 + $0x110] sm:$0xff]   ;;  %v1953_v31 = vld [vmem:[%s2335_s1 + $0x128] sm:$0xff]   ;;  %v1963_v40 = vld [vmem:[%s2335_s1 + $0x178] sm:$0xff]  }
  0x1e   : > { %1830 = vmatprep.mubr.bf16.mxu0 %v1476_v5  ;;  %v307_v12 = vsel %vm2127_vm2, %v302_v8, %v306_v3  ;;  %v1951_v32 = vld [vmem:[%s2335_s1 + $0xa8] sm:$0xff]   ;;  %v1955_v33 = vld [vmem:[%s2100_s11 + $0x64] ss:$48 sps:$4 sm:$0xff]   ;;  %v1959_v36 = vld [vmem:[%s2100_s11 + $0x60] ss:$48 sps:$4 sm:$0xff]  }
  0x1f   : > { %1827 = vmatpush3.bf16.msra.mxu0 %v1921_v18  ;;  %v1477_v14 = vcombine.low %v293_v10, %v307_v12  ;;  %v1940_v18 = vld [vmem:[%s2335_s1 + $0x150] sm:$0xff]   ;;  %v1964_v41 = vld [vmem:[%s2335_s1 + $0x138] sm:$0xff]   ;;  %v1968_v44 = vld [vmem:[%s2336_s2 + $0x40] sm:$0xff]  }
  0x20   : > { %1723 = vmatpush3.bf16.msra.mxu1 %v1923_v20  ;;  %1828 = vmatprep.subr.bf16.mxu0 %v1924_v21  ;;  %v1939_v20 = vld [vmem:[%s2335_s1 + $0x90] sm:$0xff]   ;;  %v1962_v42 = vld [vmem:[%s2335_s1 + $0xb8] sm:$0xff]   ;;  %v1972_v48 = vld [vmem:[%s2336_s2 + $0x80] sm:$0xff]  }
  0x21   : > { %1724 = vmatprep.subr.bf16.mxu1 %v1925_v22  ;;  %v1944_v22 = vld [vmem:[%s2335_s1 + $0x158] sm:$0xff]   ;;  %v1957_v38 = vld [vmem:[%s2335_s1 + $0xb0] sm:$0xff]   ;;  %v1973_v50 = vld [vmem:[%s2336_s2 + $0x48] sm:$0xff]  }
  0x22   : > { %v1967_v43 = vld [vmem:[%s2100_s11 + $0x14] ss:$48 sps:$4 sm:$0xff]   ;;  %v1965_v45 = vld [vmem:[%s2100_s11 + $0x10] ss:$48 sps:$4 sm:$0xff]   ;;  %v1974_v51 = vld [vmem:[%s2336_s2 + $0x88] sm:$0xff]  }
  0x23   : > { %1829 = vmatpush3.bf16.msra.mxu0 %v1924_v21  ;;  %v1942_v21 = vld [vmem:[%s2335_s1 + $0xd8] sm:$0xff]   ;;  %v1969_v46 = vld [vmem:[%s2100_s11 + $0x20] ss:$48 sps:$4 sm:$0xff]   ;;  %v1971_v47 = vld [vmem:[%s2100_s11 + $0x24] ss:$48 sps:$4 sm:$0xff]  }
  0x24   : > { %1725 = vmatpush3.bf16.msra.mxu1 %v1926_v27  ;;  %1738 = vmatprep.subr.bf16.mxu0 %v1927_v34  ;;  %v1949_v27 = vld [vmem:[%s2335_s1 + $0x120] sm:$0xff]   ;;  %v1954_v34 = vld [vmem:[%s2335_s1 + $0xf0] sm:$0xff]   ;;  %v1981_v56 = vld [vmem:[%s2336_s2 + $0x98] sm:$0xff]  }
  0x25   : > { %1776 = vmatprep.subr.bf16.mxu1 %v1932_v4  ;;  %v1975_v52 = vld [vmem:[%s2100_s11 + $0x74] ss:$48 sps:$4 sm:$0xff]   ;;  %v1977_v55 = vld [vmem:[%s2100_s11 + $0x70] ss:$48 sps:$4 sm:$0xff]   ;;  %v1980_v57 = vld [vmem:[%s2336_s2 + $0x58] sm:$0xff]  }
  0x26   : > { %1831 = vmatmul.mubr.bf16.vlgmr.msra.gmra.mrb[0].mxu0 %v1477_v14  ;;  %v1979_v53 = vld [vmem:[%s2336_s2 + $0x90] sm:$0xff]   ;;  %v1982_v58 = vld [vmem:[%s2336_s2 + $0x60] sm:$0xff]   ;;  %v1984_v62 = vld [vmem:[%s2336_s2 + $0x68] sm:$0xff]  }
  0x27   : > { %578 = vmatmul.mubr.bf16.vlgmr.msra.gmra.mrb[0].mxu1 %v1928_v54  ;;  %1739 = vmatpush3.bf16.msra.mxu0 %v1931_v9  ;;  %v1978_v54 = vld [vmem:[%s2336_s2 + $0x50] sm:$0xff]   ;;  %v1983_v59 = vld [vmem:[%s2336_s2 + $0xa0] sm:$0xff]   ;;  %v1985_v63 = vld [vmem:[%s2336_s2 + $0xa8] sm:$0xff]  }
  0x28   : > { %1777 = vmatpush3.bf16.msra.mxu1 %v1933_v7  ;;  %1740 = vmatprep.subr.bf16.mxu0 %v1934_v11  ;;  %v1987_v60 = vld [vmem:[%s2100_s11 + $0x84] ss:$48 sps:$4 sm:$0xff]   ;;  %v1989_v61 = vld [vmem:[%s2100_s11 + $0x80] ss:$48 sps:$4 sm:$0xff]   ;;  %v1563_v1 = vld [vmem:[%s2100_s11 + $0x18] sm:$0x1] }
  0x29   : > { %1778 = vmatprep.subr.bf16.mxu1 %v1936_v13  ;;  %585 = vmatprep.mubr.bf16.mxu1 %v1955_v33  ;;  %v1562_v0 = vld [vmem:[%s2100_s11 + $0x10] sm:$0xf]  ;;  %v1564_v2 = vld [vmem:[%s2100_s11 + $0x40] sm:$0xf]  ;;  %v1565_v3 = vld [vmem:[%s2100_s11 + $0x48] sm:$0x1] }
  0x2a   : > { %780 = vmatprep.mubr.bf16.mxu0 %v1967_v43  ;;  %v810_v4 = vshrl.u32 %v1562_v0, 16  ;;  %v813_v5 = vshll.u32 %v1562_v0, 16  ;;  %v819_v6 = vshll.u32 %v1563_v1, 16  ;;  %v824_v7 = vshrl.u32 %v1564_v2, 16  ;;  %v1990_v8 = vld [vmem:[%s2336_s2 + $0xb0] sm:$0xff]  }
  0x2b   : > { %1741 = vmatpush3.bf16.msra.mxu0 %v1935_v16  ;;  %v827_v9 = vshll.u32 %v1564_v2, 16  ;;  %v833_v10 = vshll.u32 %v1565_v3, 16  ;;  %v1566_v11 = vld [vmem:[%s2100_s11 + $0x70] sm:$0xf]  ;;  %v1567_v12 = vld [vmem:[%s2100_s11 + $0x78] sm:$0x1] }
  0x2c   : > { %1779 = vmatpush3.bf16.msra.mxu1 %v1937_v15  ;;  %1742 = vmatprep.subr.bf16.mxu0 %v1938_v17  ;;  %v812_v13 = vrot.slane %v810_v4, 4  ;;  %v815_v14 = vrot.slane %v813_v5, 5  ;;  %v821_v15 = vrot.slane %v819_v6, 5  ;;  %v826_v16 = vrot.slane %v824_v7, 4  ;;  %v1568_v17 = vld [vmem:[%s2100_s11 + $0xa0] sm:$0xf] }
  0x2d   : > { %1780 = vmatprep.subr.bf16.mxu1 %v1940_v18  ;;  %v829_v18 = vrot.slane %v827_v9, 5  ;;  %v1653_v33 = vld [vmem:[%s2100_s11 + $0x28] sm:$0x1]  ;;  %v1658_v0 = vld [vmem:[%s2100_s11 + $0xb0] sm:$0xf] }
  0x2e   : > { %v1659_v3 = vld [vmem:[%s2100_s11 + $0xb8] sm:$0x1] }
  0x2f   : > { %1743 = vmatpush3.bf16.msra.mxu0 %v1939_v20  ;;  %586 = vmatmul.mubr.bf16.gmra.mrb[4].mxu1 %v1959_v36  ;;  %v1569_v20 = vld [vmem:[%s2100_s11 + $0xa8] sm:$0x1] }
  0x30   : > { %1781 = vmatpush3.bf16.msra.mxu1 %v1941_v19  ;;  %1744 = vmatprep.subr.bf16.mxu0 %v1942_v21  ;;  %v835_v19 = vrot.slane %v833_v10, 5  ;;  %v838_v21 = vshrl.u32 %v1566_v11, 16 }
  0x31   : > { %1782 = vmatprep.subr.bf16.mxu1 %v1944_v22  ;;  %1177 = vmatprep.mubr.bf16.mxu1 %v1971_v47  ;;  %v841_v22 = vshll.u32 %v1566_v11, 16  ;;  %v1655_v47 = vld [vmem:[%s2100_s11 + $0x58] sm:$0x1] }
  0x33   : > { %1745 = vmatpush3.bf16.msra.mxu0 %v1943_v24  ;;  %v816_v24 = vor.u32 %v815_v14, %v812_v13  ;;  %v1249_v13 = vshrl.u32 %v1658_v0, 16 }
  0x34   : > { %1783 = vmatpush3.bf16.msra.mxu1 %v1945_v23  ;;  %1746 = vmatprep.subr.bf16.mxu0 %v1946_v25  ;;  %v1986_v23 = vld [vmem:[%s2336_s2 + $0x70] sm:$0xff]   ;;  %v847_v25 = vshll.u32 %v1567_v12, 16 }
  0x35   : > { %1784 = vmatprep.subr.bf16.mxu1 %v1948_v26  ;;  %v852_v26 = vshrl.u32 %v1568_v17, 16 }
  0x37   : > { %1747 = vmatpush3.bf16.msra.mxu0 %v1947_v28  ;;  %v1652_v28 = vld [vmem:[%s2100_s11 + $0x20] sm:$0xf]  ;;  %v854_v36 = vrot.slane %v852_v26, 4 }
  0x38   : > { %1785 = vmatpush3.bf16.msra.mxu1 %v1949_v27  ;;  %1748 = vmatprep.subr.bf16.mxu0 %v1950_v29  ;;  %v855_v27 = vshll.u32 %v1568_v17, 16  ;;  %v830_v29 = vor.u32 %v829_v18, %v826_v16  ;;  %v1207_v43 = vshrl.u32 %v1652_v28, 16  ;;  %v1252_v16 = vshll.u32 %v1658_v0, 16 }
  0x39   : > { %1786 = vmatprep.subr.bf16.mxu1 %v1952_v30  ;;  %v840_v30 = vrot.slane %v838_v21, 4  ;;  %v1258_v17 = vshll.u32 %v1659_v3, 16 }
  0x3b   : > { %1749 = vmatpush3.bf16.msra.mxu0 %v1951_v32  ;;  %v861_v32 = vshll.u32 %v1569_v20, 16 }
  0x3c   : > { %1787 = vmatpush3.bf16.msra.mxu1 %v1953_v31  ;;  %1750 = vmatprep.subr.bf16.mxu0 %v1954_v34  ;;  %v843_v31 = vrot.slane %v841_v22, 5  ;;  %v817_v34 = vrot.slane %v816_v24, 4 }
  0x3d   : > { %1788 = vmatprep.subr.bf16.mxu1 %v1958_v35  ;;  %v849_v35 = vrot.slane %v847_v25, 5 }
  0x3f   : > { %1751 = vmatpush3.bf16.msra.mxu0 %v1957_v38  ;;  %v1654_v38 = vld [vmem:[%s2100_s11 + $0x50] sm:$0xf] }
  0x40   : > { %1789 = vmatpush3.bf16.msra.mxu1 %v1960_v37  ;;  %1752 = vmatprep.subr.bf16.mxu0 %v1961_v39  ;;  %v857_v37 = vrot.slane %v855_v27, 5  ;;  %v1992_v39 = vld [vmem:[%s2336_s2 + $0xb8] sm:$0xff]   ;;  %v1260_v27 = vrot.slane %v1258_v17, 5 }
  0x41   : > { %1790 = vmatprep.subr.bf16.mxu1 %v1963_v40  ;;  %v831_v40 = vrot.slane %v830_v29, 4 }
  0x43   : > { %1753 = vmatpush3.bf16.msra.mxu0 %v1962_v42  ;;  %v863_v42 = vrot.slane %v861_v32, 5 }
  0x44   : > { %1791 = vmatpush3.bf16.msra.mxu1 %v1964_v41  ;;  %1834 = vmatprep.subr.bf16.mxu0 %v1968_v44  ;;  %v844_v41 = vor.u32 %v843_v31, %v840_v30 }
  0x45   : > { %1854 = vmatprep.subr.bf16.mxu1 %v1972_v48 }
  0x46   : > { %781 = vmatmul.mubr.bf16.vlgmr.msra.gmra.mrb[4].mxu0 %v1965_v45  ;;  %v822_v45 = vsel %vm2127_vm2, %v817_v34, %v821_v15 }
  0x47   : > { %1178 = vmatmul.mubr.bf16.vlgmr.msra.gmra.mrb[8].mxu1 %v1969_v46  ;;  %1835 = vmatpush3.bf16.msra.mxu0 %v1968_v44  ;;  %v1991_v44 = vld [vmem:[%s2336_s2 + $0x78] sm:$0xff]   ;;  %v858_v46 = vor.u32 %v857_v37, %v854_v36 }
  0x48   : > { %1855 = vmatpush3.bf16.msra.mxu1 %v1972_v48  ;;  %1836 = vmatprep.subr.bf16.mxu0 %v1973_v50  ;;  %v1210_v48 = vshll.u32 %v1652_v28, 16 }
  0x49   : > { %1856 = vmatprep.subr.bf16.mxu1 %v1974_v51  ;;  %788 = vmatprep.mubr.bf16.mxu0 %v1975_v52  ;;  %v845_v52 = vrot.slane %v844_v41, 4 }
  0x4a   : > { %1185 = vmatprep.mubr.bf16.mxu1 %v1987_v60 }
  0x4b   : > { %1837 = vmatpush3.bf16.msra.mxu0 %v1973_v50  ;;  %v1216_v50 = vshll.u32 %v1653_v33, 16  ;;  %v850_v60 = vsel %vm2127_vm2, %v845_v52, %v849_v35 }
  0x4c   : > { %1857 = vmatpush3.bf16.msra.mxu1 %v1974_v51  ;;  %1838 = vmatprep.subr.bf16.mxu0 %v1978_v54  ;;  %v836_v51 = vsel %vm2127_vm2, %v831_v40, %v835_v19  ;;  %v1251_v19 = vrot.slane %v1249_v13, 4 }
  0x4d   : > { %1858 = vmatprep.subr.bf16.mxu1 %v1979_v53  ;;  %v1218_v7 = vrot.slane %v1216_v50, 5 }
  0x4e   : > { %789 = vmatmul.mubr.bf16.gmra.mrb[8].mxu0 %v1977_v55  ;;  %v1656_v55 = vld [vmem:[%s2100_s11 + $0x80] sm:$0xf] }
  0x4f   : > { %1839 = vmatpush3.bf16.msra.mxu0 %v1978_v54  ;;  %1186 = vmatmul.mubr.bf16.gmra.mrb[12].mxu1 %v1989_v61  ;;  %v1221_v54 = vshrl.u32 %v1654_v38, 16  ;;  %v1235_v4 = vshrl.u32 %v1656_v55, 16  ;;  %v1238_v5 = vshll.u32 %v1656_v55, 16 }
  0x50   : > { %1859 = vmatpush3.bf16.msra.mxu1 %v1979_v53  ;;  %1840 = vmatprep.subr.bf16.mxu0 %v1980_v57  ;;  %v1209_v53 = vrot.slane %v1207_v43, 4 }
  0x51   : > { %1860 = vmatprep.subr.bf16.mxu1 %v1981_v56  ;;  %v1223_v61 = vrot.slane %v1221_v54, 4  ;;  %v1237_v11 = vrot.slane %v1235_v4, 4  ;;  %v1240_v12 = vrot.slane %v1238_v5, 5 }
  0x53   : > { %1841 = vmatpush3.bf16.msra.mxu0 %v1980_v57  ;;  %v859_v57 = vrot.slane %v858_v46, 4  ;;  %v1241_v18 = vor.u32 %v1240_v12, %v1237_v11 }
  0x54   : > { %1861 = vmatpush3.bf16.msra.mxu1 %v1981_v56  ;;  %1842 = vmatprep.subr.bf16.mxu0 %v1982_v58  ;;  %v1586_v56 = vcombine.low %v822_v45, %v836_v51 }
  0x55   : > { %1862 = vmatprep.subr.bf16.mxu1 %v1983_v59  ;;  %v864_v1 = vsel %vm2127_vm2, %v859_v57, %v863_v42  ;;  %v1242_v24 = vrot.slane %v1241_v18, 4 }
  0x56   : > { %1850 = vmatprep.mubr.bf16.mxu0 %v1586_v56  ;;  %v1587_v6 = vcombine.low %v850_v60, %v864_v1 }
  0x57   : > { %1843 = vmatpush3.bf16.msra.mxu0 %v1982_v58  ;;  %v1212_v58 = vrot.slane %v1210_v48, 5 }
  0x58   : > { %1863 = vmatpush3.bf16.msra.mxu1 %v1983_v59  ;;  %1844 = vmatprep.subr.bf16.mxu0 %v1984_v62  ;;  %v1657_v59 = vld [vmem:[%s2100_s11 + $0x88] sm:$0x1] }
  0x59   : > { %1864 = vmatprep.subr.bf16.mxu1 %v1985_v63  ;;  %v1213_v2 = vor.u32 %v1212_v58, %v1209_v53  ;;  %v1244_v9 = vshll.u32 %v1657_v59, 16 }
  0x5b   : > { %1845 = vmatpush3.bf16.msra.mxu0 %v1984_v62  ;;  %v1224_v62 = vshll.u32 %v1654_v38, 16  ;;  %v1214_v10 = vrot.slane %v1213_v2, 4  ;;  %v1246_v22 = vrot.slane %v1244_v9, 5 }
  0x5c   : > { %1865 = vmatpush3.bf16.msra.mxu1 %v1985_v63  ;;  %1846 = vmatprep.subr.bf16.mxu0 %v1986_v23  ;;  %v1230_v63 = vshll.u32 %v1655_v47, 16 }
  0x5d   : > { %1866 = vmatprep.subr.bf16.mxu1 %v1990_v8  ;;  %v1219_v20 = vsel %vm2127_vm2, %v1214_v10, %v1218_v7  ;;  %v1247_v29 = vsel %vm2127_vm2, %v1242_v24, %v1246_v22  ;;  %v1686_v22 = vld [vmem:[%s2337_s3] ss:$0 sm:$0xff] }
  0x5e   : > { %v1232_v15 = vrot.slane %v1230_v63, 5 }
  0x5f   : > { %1847 = vmatpush3.bf16.msra.mxu0 %v1986_v23  ;;  %v1254_v23 = vrot.slane %v1252_v16, 5 }
  0x60   : > { %1867 = vmatpush3.bf16.msra.mxu1 %v1990_v8  ;;  %1848 = vmatprep.subr.bf16.mxu0 %v1991_v44  ;;  %v1226_v8 = vrot.slane %v1224_v62, 5 }
  0x61   : > { %1868 = vmatprep.subr.bf16.mxu1 %v1992_v39  ;;  %v1255_v26 = vor.u32 %v1254_v23, %v1251_v19 }
  0x62   : > { %v1227_v14 = vor.u32 %v1226_v8, %v1223_v61 }
  0x63   : > { %1849 = vmatpush3.bf16.msra.mxu0 %v1991_v44  ;;  %v1256_v30 = vrot.slane %v1255_v26, 4 }
  0x64   : > { %1869 = vmatpush3.bf16.msra.mxu1 %v1992_v39  ;;  %v1228_v21 = vrot.slane %v1227_v14, 4 }
  0x65   : > { %v1261_v31 = vsel %vm2127_vm2, %v1256_v30, %v1260_v27 }
  0x66   : > { %1851 = vmatmul.mubr.bf16.vlgmr.msra.gmra.mrb[0].mxu0 %v1587_v6  ;;  %v1233_v25 = vsel %vm2127_vm2, %v1228_v21, %v1232_v15  ;;  %v1677_v32 = vcombine.low %v1247_v29, %v1261_v31 }
  0x67   : > { %v1676_v28 = vcombine.low %v1219_v20, %v1233_v25 }
  0x69   : > { %1870 = vmatprep.mubr.bf16.mxu1 %v1676_v28 }
  0x6a   : > { %1871 = vmatmul.mubr.bf16.vlgmr.msra.gmra.mrb[16].mxu1 %v1677_v32 }
  0xfa   : > { %v1726_v33 = vpop.f32.mrb[0].mxu1 }
  0xfb   : > { %v1727_v34 = vpop.f32.mrb[1].mxu1 }
  0xfc   : > { %v1728_v35 = vadd.f32 %v1727_v34, %v1726_v33  ;;  %v1729_v36 = vpop.f32.mrb[2].mxu1 }
  0xfd   : > { %v1730_v37 = vpop.f32.mrb[3].mxu1 }
  0xfe   : > { %v1731_v38 = vadd.f32 %v1730_v37, %v1729_v36 }
 0x102   : > { %v1732_v39 = vpop.f32.mrb[4].mxu1 }
 0x103   : > { %v1733_v40 = vpop.f32.mrb[5].mxu1 }
 0x104   : > { %v1734_v41 = vadd.f32 %v1733_v40, %v1732_v39  ;;  %v1735_v42 = vpop.f32.mrb[6].mxu1 }
 0x105   : > { %v1736_v43 = vpop.f32.mrb[7].mxu1 }
 0x106   : > { %v1737_v44 = vadd.f32 %v1736_v43, %v1735_v42 }
 0x119   : > { %v1754_v46 = vpop.f32.mrb[4].mxu0 }
 0x11a   : > { %v1792_v45 = vpop.f32.mrb[8].mxu1  ;;  %v1755_v48 = vpop.f32.mrb[5].mxu0 }
 0x11b   : > { %v1793_v47 = vpop.f32.mrb[9].mxu1  ;;  %v1756_v51 = vadd.f32 %v1755_v48, %v1754_v46  ;;  %v1757_v52 = vpop.f32.mrb[6].mxu0 }
 0x11c   : > { %v1794_v49 = vadd.f32 %v1793_v47, %v1792_v45  ;;  %v1795_v50 = vpop.f32.mrb[10].mxu1  ;;  %v1758_v54 = vpop.f32.mrb[7].mxu0 }
 0x11d   : > { %v1796_v53 = vpop.f32.mrb[11].mxu1  ;;  %v1759_v56 = vadd.f32 %v1758_v54, %v1757_v52  ;;  %v1878_v57 = vadd.f32 %v1756_v51, %v1728_v35 }
 0x11e   : > { %v1797_v55 = vadd.f32 %v1796_v53, %v1795_v50 }
 0x11f   : > { %v1886_v58 = vadd.f32 %v1759_v56, %v1731_v38 }
 0x121   : > { %v1760_v59 = vpop.f32.mrb[8].mxu0 }
 0x122   : > { %v1761_v60 = vpop.f32.mrb[9].mxu0  ;;  %v1798_v2 = vpop.f32.mrb[12].mxu1 }
 0x123   : > { %v1762_v61 = vadd.f32 %v1761_v60, %v1760_v59  ;;  %v1763_v62 = vpop.f32.mrb[10].mxu0  ;;  %v1799_v4 = vpop.f32.mrb[13].mxu1 }
 0x124   : > { %v1764_v63 = vpop.f32.mrb[11].mxu0  ;;  %v1800_v5 = vadd.f32 %v1799_v4, %v1798_v2  ;;  %v1801_v6 = vpop.f32.mrb[14].mxu1 }
 0x125   : > { %v1765_v0 = vadd.f32 %v1764_v63, %v1763_v62  ;;  %v1874_v1 = vadd.f32 %v1762_v61, %v1734_v41  ;;  %v1802_v7 = vpop.f32.mrb[15].mxu1 }
 0x126   : > { %v1803_v8 = vadd.f32 %v1802_v7, %v1801_v6 }
 0x127   : > { %v1882_v3 = vadd.f32 %v1765_v0, %v1737_v44 }
 0x139   : > { %v1852_v9 = vpop.f32.mrb[0].mxu0 }
 0x13a   : > { %v1875_v10 = vadd.f32 %v1874_v1, %v1852_v9  ;;  %v972_v11 = vpop.f32.mrb[1].mxu0 }
 0x13b   : > { %v1879_v12 = vadd.f32 %v1878_v57, %v972_v11  ;;  %v1853_v13 = vpop.f32.mrb[2].mxu0 }
 0x13c   : > { %v1876_v14 = vadd.f32 %v1875_v10, %v1800_v5  ;;  %v1883_v15 = vadd.f32 %v1882_v3, %v1853_v13  ;;  %v975_v16 = vpop.f32.mrb[3].mxu0 }
 0x13d   : > { %v1880_v17 = vadd.f32 %v1879_v12, %v1794_v49  ;;  %v1887_v18 = vadd.f32 %v1886_v58, %v975_v16  ;;  %v1872_v21 = vpop.f32.mrb[16].mxu1 }
 0x13e   : > { %v1884_v19 = vadd.f32 %v1883_v15, %v1803_v8  ;;  %v1877_v23 = vadd.f32 %v1876_v14, %v1872_v21  ;;  %v1369_v24 = vpop.f32.mrb[17].mxu1 }
 0x13f   : > { %v1888_v20 = vadd.f32 %v1887_v18, %v1797_v55  ;;  %v1881_v25 = vadd.f32 %v1880_v17, %v1369_v24  ;;  %v1873_v26 = vpop.f32.mrb[18].mxu1 }
 0x140   : > { %v1397_v27 = vadd.f32 %v1877_v23, %v1686_v22  ;;  %v1885_v28 = vadd.f32 %v1884_v19, %v1873_v26  ;;  %v1372_v29 = vpop.f32.mrb[19].mxu1 }
 0x141   : > { %v1395_v30 = vadd.f32 %v1881_v25, %v1686_v22  ;;  %v1889_v31 = vadd.f32 %v1888_v20, %v1372_v29 }
 0x142   : > { %v1398_v32 = vadd.f32 %v1885_v28, %v1686_v22  ;;  %v1401_v34 = vmax.f32 %v1397_v27, 0.0 }
 0x143   : > { %v1396_v33 = vadd.f32 %v1889_v31, %v1686_v22  ;;  %v1399_v36 = vmax.f32 %v1395_v30, 0.0 }
 0x144   : > { %v1402_v35 = vmax.f32 %v1398_v32, 0.0 }
 0x145   : > { %v1400_v37 = vmax.f32 %v1396_v33, 0.0 }
 0x146   : > { %v1697_v38 = vpack.c.bf16 %v1402_v35, %v1401_v34 }
 0x147   : > { %v1692_v39 = vpack.c.bf16 %v1400_v37, %v1399_v36 }
 0x148   : > { %1699 = vst [vmem:[%s202_s29 + $0x8] sm:$0xff] %v1697_v38  }
 0x149   : > { %1693 = vst [vmem:[%s202_s29] sm:$0xff] %v1692_v39  }
 0x14a PF: > { %s14_s15 = sadd.s32 1, %s1999_s15  }
 0x14b   : > { %p11_p4 = scmp.ge.s32.totalorder %s14_s15, 4  }
 0x14d   :  { %13 = sbr.rel (!%p11_p4) target bundleno = 1 (0x1), region = 72 }

// kernel: conv_subsampling_forward.5
= control target key start
LH: loop header
LB: loop body
LE: loop exit
PB: predicated region body
PF: predicated region fallthrough
CT: control target
= control target key end

     0   :  { %s1253_s0 = inlined_call_operand.vmem [shape: bf16[8,1024], index: 0, kind: input, shape index: {}]   ;;  %s1254_s1 = inlined_call_operand.vmem [shape: bf16[1024,128], index: 1, kind: input, shape index: {}]   ;;  %s1255_s2 = inlined_call_operand.vmem [shape: f32[1,128], index: 2, kind: input, shape index: {}]   ;;  %s1256_s3 = inlined_call_operand.hbm [shape: f32[8,128], index: 3, kind: output, shape index: {}]  }
   0x1   :  { %v917_v0 = vld [vmem:[%s1254_s1 + $0x40] sm:$0xff]   ;;  %v921_v4 = vld [vmem:[%s1254_s1 + $0x48] sm:$0xff]   ;;  %v925_v8 = vld [vmem:[%s1254_s1 + $0x50] sm:$0xff]  }
   0x2   :  { %v918_v1 = vld [vmem:[%s1254_s1 + $0xc0] sm:$0xff]   ;;  %828 = vmatprep.subr.bf16.mxu0 %v917_v0  ;;  %v922_v5 = vld [vmem:[%s1254_s1 + $0xc8] sm:$0xff]   ;;  %v926_v9 = vld [vmem:[%s1254_s1 + $0xd0] sm:$0xff]  }
   0x3   :  { %v919_v2 = vld [vmem:[%s1254_s1] sm:$0xff]   ;;  %850 = vmatprep.subr.bf16.mxu1 %v918_v1  ;;  %v923_v6 = vld [vmem:[%s1254_s1 + $0x8] sm:$0xff]   ;;  %v927_v10 = vld [vmem:[%s1254_s1 + $0x10] sm:$0xff]  }
   0x4   :  { %v920_v3 = vld [vmem:[%s1254_s1 + $0x80] sm:$0xff]   ;;  %829 = vmatpush3.bf16.msra.mxu0 %v919_v2  ;;  %v924_v7 = vld [vmem:[%s1254_s1 + $0x88] sm:$0xff]   ;;  %v928_v11 = vld [vmem:[%s1254_s1 + $0x90] sm:$0xff]  }
   0x5   :  { %851 = vmatpush3.bf16.msra.mxu1 %v920_v3  ;;  %830 = vmatprep.subr.bf16.mxu0 %v921_v4  ;;  %v929_v12 = vld [vmem:[%s1254_s1 + $0x58] sm:$0xff]   ;;  %v933_v16 = vld [vmem:[%s1254_s1 + $0x60] sm:$0xff]   ;;  %v937_v20 = vld [vmem:[%s1254_s1 + $0x68] sm:$0xff]  }
   0x6   :  { %852 = vmatprep.subr.bf16.mxu1 %v922_v5  ;;  %v930_v13 = vld [vmem:[%s1254_s1 + $0xd8] sm:$0xff]   ;;  %v934_v17 = vld [vmem:[%s1254_s1 + $0xe0] sm:$0xff]   ;;  %v938_v21 = vld [vmem:[%s1254_s1 + $0xe8] sm:$0xff]  }
   0x7   :  { %v931_v14 = vld [vmem:[%s1254_s1 + $0x18] sm:$0xff]   ;;  %v935_v18 = vld [vmem:[%s1254_s1 + $0x20] sm:$0xff]   ;;  %v939_v22 = vld [vmem:[%s1254_s1 + $0x28] sm:$0xff]  }
   0x8   :  { %831 = vmatpush3.bf16.msra.mxu0 %v923_v6  ;;  %v932_v15 = vld [vmem:[%s1254_s1 + $0x98] sm:$0xff]   ;;  %v936_v19 = vld [vmem:[%s1254_s1 + $0xa0] sm:$0xff]   ;;  %v940_v23 = vld [vmem:[%s1254_s1 + $0xa8] sm:$0xff]  }
   0x9   :  { %853 = vmatpush3.bf16.msra.mxu1 %v924_v7  ;;  %832 = vmatprep.subr.bf16.mxu0 %v925_v8  ;;  %v941_v24 = vld [vmem:[%s1254_s1 + $0x70] sm:$0xff]   ;;  %v945_v28 = vld [vmem:[%s1254_s1 + $0x78] sm:$0xff]   ;;  %v22_v32 = vld [vmem:[%s1253_s0] sm:$0xff] }
   0xa   :  { %854 = vmatprep.subr.bf16.mxu1 %v926_v9  ;;  %v942_v25 = vld [vmem:[%s1254_s1 + $0xf0] sm:$0xff]   ;;  %v946_v29 = vld [vmem:[%s1254_s1 + $0xf8] sm:$0xff]   ;;  %v23_v33 = vld [vmem:[%s1253_s0 + $0x8] sm:$0xff]  ;;  %v755_v34 = vcombine.low %v22_v32, %v22_v32  ;;  %v756_v35 = vcombine.high %v22_v32, %v22_v32 }
   0xb   :  { %v943_v26 = vld [vmem:[%s1254_s1 + $0x30] sm:$0xff]   ;;  %v947_v30 = vld [vmem:[%s1254_s1 + $0x38] sm:$0xff]   ;;  %v757_v36 = vcombine.low %v23_v33, %v23_v33  ;;  %v758_v37 = vcombine.high %v23_v33, %v23_v33  ;;  %v953_v38 = vld [vmem:[%s1254_s1 + $0x140] sm:$0xff]  }
   0xc   :  { %833 = vmatpush3.bf16.msra.mxu0 %v927_v10  ;;  %v944_v27 = vld [vmem:[%s1254_s1 + $0xb0] sm:$0xff]   ;;  %v948_v31 = vld [vmem:[%s1254_s1 + $0xb8] sm:$0xff]   ;;  %v954_v39 = vld [vmem:[%s1254_s1 + $0x1c0] sm:$0xff]   ;;  %598 = vmatprep.mubr.bf16.mxu0 %v756_v35 }
   0xd   :  { %855 = vmatpush3.bf16.msra.mxu1 %v928_v11  ;;  %834 = vmatprep.subr.bf16.mxu0 %v929_v12  ;;  %v955_v40 = vld [vmem:[%s1254_s1 + $0x100] sm:$0xff]   ;;  %v957_v42 = vld [vmem:[%s1254_s1 + $0x148] sm:$0xff]   ;;  %v961_v46 = vld [vmem:[%s1254_s1 + $0x150] sm:$0xff]  }
   0xe   :  { %856 = vmatprep.subr.bf16.mxu1 %v930_v13  ;;  %638 = vmatprep.mubr.bf16.mxu1 %v758_v37  ;;  %v956_v41 = vld [vmem:[%s1254_s1 + $0x180] sm:$0xff]   ;;  %v958_v43 = vld [vmem:[%s1254_s1 + $0x1c8] sm:$0xff]   ;;  %v962_v47 = vld [vmem:[%s1254_s1 + $0x1d0] sm:$0xff]  }
   0xf   :  { %v959_v44 = vld [vmem:[%s1254_s1 + $0x108] sm:$0xff]   ;;  %v963_v48 = vld [vmem:[%s1254_s1 + $0x110] sm:$0xff]   ;;  %v965_v50 = vld [vmem:[%s1254_s1 + $0x158] sm:$0xff]  }
  0x10   :  { %835 = vmatpush3.bf16.msra.mxu0 %v931_v14  ;;  %v960_v45 = vld [vmem:[%s1254_s1 + $0x188] sm:$0xff]   ;;  %v964_v49 = vld [vmem:[%s1254_s1 + $0x190] sm:$0xff]   ;;  %v966_v51 = vld [vmem:[%s1254_s1 + $0x1d8] sm:$0xff]  }
  0x11   :  { %857 = vmatpush3.bf16.msra.mxu1 %v932_v15  ;;  %836 = vmatprep.subr.bf16.mxu0 %v933_v16  ;;  %v967_v52 = vld [vmem:[%s1254_s1 + $0x118] sm:$0xff]   ;;  %v969_v54 = vld [vmem:[%s1254_s1 + $0x160] sm:$0xff]   ;;  %v973_v58 = vld [vmem:[%s1254_s1 + $0x168] sm:$0xff]  }
  0x12   :  { %858 = vmatprep.subr.bf16.mxu1 %v934_v17  ;;  %v968_v53 = vld [vmem:[%s1254_s1 + $0x198] sm:$0xff]   ;;  %v970_v55 = vld [vmem:[%s1254_s1 + $0x1e0] sm:$0xff]   ;;  %v974_v59 = vld [vmem:[%s1254_s1 + $0x1e8] sm:$0xff]  }
  0x13   :  { %v971_v56 = vld [vmem:[%s1254_s1 + $0x120] sm:$0xff]   ;;  %v975_v60 = vld [vmem:[%s1254_s1 + $0x128] sm:$0xff]   ;;  %v977_v62 = vld [vmem:[%s1254_s1 + $0x170] sm:$0xff]  }
  0x14   :  { %837 = vmatpush3.bf16.msra.mxu0 %v935_v18  ;;  %v972_v57 = vld [vmem:[%s1254_s1 + $0x1a0] sm:$0xff]   ;;  %v976_v61 = vld [vmem:[%s1254_s1 + $0x1a8] sm:$0xff]   ;;  %v978_v63 = vld [vmem:[%s1254_s1 + $0x1f0] sm:$0xff]  }
  0x15   :  { %859 = vmatpush3.bf16.msra.mxu1 %v936_v19  ;;  %838 = vmatprep.subr.bf16.mxu0 %v937_v20  ;;  %v979_v0 = vld [vmem:[%s1254_s1 + $0x130] sm:$0xff]   ;;  %v981_v2 = vld [vmem:[%s1254_s1 + $0x178] sm:$0xff]  }
  0x16   :  { %860 = vmatprep.subr.bf16.mxu1 %v938_v21  ;;  %v980_v1 = vld [vmem:[%s1254_s1 + $0x1b0] sm:$0xff]   ;;  %v982_v3 = vld [vmem:[%s1254_s1 + $0x1f8] sm:$0xff]  }
  0x17   :  { %v983_v4 = vld [vmem:[%s1254_s1 + $0x138] sm:$0xff]   ;;  %v24_v6 = vld [vmem:[%s1253_s0 + $0x10] sm:$0xff] }
  0x18   :  { %839 = vmatpush3.bf16.msra.mxu0 %v939_v22  ;;  %v984_v5 = vld [vmem:[%s1254_s1 + $0x1b8] sm:$0xff]   ;;  %v759_v7 = vcombine.low %v24_v6, %v24_v6  ;;  %v760_v8 = vcombine.high %v24_v6, %v24_v6 }
  0x19   :  { %861 = vmatpush3.bf16.msra.mxu1 %v940_v23  ;;  %840 = vmatprep.subr.bf16.mxu0 %v941_v24  ;;  %v25_v9 = vld [vmem:[%s1253_s0 + $0x18] sm:$0xff] }
  0x1a   :  { %862 = vmatprep.subr.bf16.mxu1 %v942_v25 }
  0x1c   :  { %841 = vmatpush3.bf16.msra.mxu0 %v943_v26 }
  0x1d   :  { %863 = vmatpush3.bf16.msra.mxu1 %v944_v27  ;;  %842 = vmatprep.subr.bf16.mxu0 %v945_v28 }
  0x1e   :  { %864 = vmatprep.subr.bf16.mxu1 %v946_v29 }
  0x20   :  { %843 = vmatpush3.bf16.msra.mxu0 %v947_v30 }
  0x21   :  { %865 = vmatpush3.bf16.msra.mxu1 %v948_v31  ;;  %872 = vmatprep.subr.bf16.mxu0 %v953_v38 }
  0x22   :  { %894 = vmatprep.subr.bf16.mxu1 %v954_v39 }
  0x23   :  { %599 = vmatmul.mubr.bf16.vlgmr.msra.gmra.mrb[0].mxu0 %v755_v34 }
  0x24   :  { %639 = vmatmul.mubr.bf16.vlgmr.msra.gmra.mrb[0].mxu1 %v757_v36  ;;  %873 = vmatpush3.bf16.msra.mxu0 %v955_v40 }
  0x25   :  { %895 = vmatpush3.bf16.msra.mxu1 %v956_v41  ;;  %874 = vmatprep.subr.bf16.mxu0 %v957_v42 }
  0x26   :  { %896 = vmatprep.subr.bf16.mxu1 %v958_v43 }
  0x28   :  { %875 = vmatpush3.bf16.msra.mxu0 %v959_v44 }
  0x29   :  { %897 = vmatpush3.bf16.msra.mxu1 %v960_v45  ;;  %876 = vmatprep.subr.bf16.mxu0 %v961_v46 }
  0x2a   :  { %898 = vmatprep.subr.bf16.mxu1 %v962_v47 }
  0x2c   :  { %877 = vmatpush3.bf16.msra.mxu0 %v963_v48 }
  0x2d   :  { %899 = vmatpush3.bf16.msra.mxu1 %v964_v49  ;;  %878 = vmatprep.subr.bf16.mxu0 %v965_v50 }
  0x2e   :  { %900 = vmatprep.subr.bf16.mxu1 %v966_v51 }
  0x30   :  { %879 = vmatpush3.bf16.msra.mxu0 %v967_v52 }
  0x31   :  { %901 = vmatpush3.bf16.msra.mxu1 %v968_v53  ;;  %880 = vmatprep.subr.bf16.mxu0 %v969_v54 }
  0x32   :  { %902 = vmatprep.subr.bf16.mxu1 %v970_v55 }
  0x34   :  { %881 = vmatpush3.bf16.msra.mxu0 %v971_v56 }
  0x35   :  { %903 = vmatpush3.bf16.msra.mxu1 %v972_v57  ;;  %882 = vmatprep.subr.bf16.mxu0 %v973_v58 }
  0x36   :  { %904 = vmatprep.subr.bf16.mxu1 %v974_v59 }
  0x38   :  { %883 = vmatpush3.bf16.msra.mxu0 %v975_v60 }
  0x39   :  { %905 = vmatpush3.bf16.msra.mxu1 %v976_v61  ;;  %884 = vmatprep.subr.bf16.mxu0 %v977_v62 }
  0x3a   :  { %906 = vmatprep.subr.bf16.mxu1 %v978_v63 }
  0x3c   :  { %885 = vmatpush3.bf16.msra.mxu0 %v979_v0 }
  0x3d   :  { %907 = vmatpush3.bf16.msra.mxu1 %v980_v1  ;;  %886 = vmatprep.subr.bf16.mxu0 %v981_v2 }
  0x3e   :  { %908 = vmatprep.subr.bf16.mxu1 %v982_v3 }
  0x3f   :  { %8 = vsyncpa [#allocation4], 0  ;;  %v761_v10 = vcombine.low %v25_v9, %v25_v9  ;;  %v762_v11 = vcombine.high %v25_v9, %v25_v9  ;;  %678 = vmatprep.mubr.bf16.mxu0 %v760_v8  ;;  %v827_v34 = vld [vmem:[%s1255_s2] ss:$0 sm:$0xff]  ;;  %s1013_s13 = smov [#allocation3]  }
  0x40   :  { %887 = vmatpush3.bf16.msra.mxu0 %v983_v4  ;;  %s747_s14 = sshll.u32 %s1013_s13, 4  ;;  %s748_s14 = int_to_ptr.vmem [resolvable:$true] %s747_s14 }
  0x41   :  { %909 = vmatpush3.bf16.msra.mxu1 %v984_v5  ;;  %718 = vmatprep.mubr.bf16.mxu1 %v762_v11  ;;  %s989_s15 = scalar_lea.vmem %s748_s14, 128  ;;  %p994_p1 = scmp.lt.s32.totalorder %s748_s14, %s748_s14 }
  0x42   :  { %p990_p0 = scmp.ne.s32.totalorder %s748_s14, %s989_s15  ;;  %p995_p2 = scmp.lt.s32.totalorder %s989_s15, %s989_s15 }
  0x43   :  { %679 = vmatmul.mubr.bf16.vlgmr.msra.gmra.mrb[4].mxu0 %v759_v7 }
  0x44   :  { %719 = vmatmul.mubr.bf16.vlgmr.msra.gmra.mrb[4].mxu1 %v761_v10  ;;  %p996_p3 = por %p995_p2, %p994_p1 }
  0x46   :  { %p997_p4 = pnand %p996_p3, %p990_p0 }
  0xf6   :  { %v844_v12 = vpop.f32.mrb[0].mxu0 }
  0xf7   :  { %v866_v13 = vpop.f32.mrb[0].mxu1  ;;  %v845_v14 = vpop.f32.mrb[1].mxu0 }
  0xf8   :  { %v867_v15 = vpop.f32.mrb[1].mxu1  ;;  %v846_v16 = vadd.f32 %v845_v14, %v844_v12  ;;  %v847_v18 = vpop.f32.mrb[2].mxu0 }
  0xf9   :  { %v868_v17 = vadd.f32 %v867_v15, %v866_v13  ;;  %v869_v19 = vpop.f32.mrb[2].mxu1  ;;  %v848_v20 = vpop.f32.mrb[3].mxu0 }
  0xfa   :  { %v870_v21 = vpop.f32.mrb[3].mxu1 }
  0xfb   :  { %v641_v22 = vadd.f32 %v868_v17, %v846_v16 }
 0x116   :  { %v888_v23 = vpop.f32.mrb[4].mxu0 }
 0x117   :  { %v910_v24 = vpop.f32.mrb[4].mxu1  ;;  %v889_v25 = vpop.f32.mrb[5].mxu0 }
 0x118   :  { %v911_v26 = vpop.f32.mrb[5].mxu1  ;;  %v890_v27 = vadd.f32 %v889_v25, %v888_v23  ;;  %v891_v29 = vpop.f32.mrb[6].mxu0 }
 0x119   :  { %v912_v28 = vadd.f32 %v911_v26, %v910_v24  ;;  %v913_v30 = vpop.f32.mrb[6].mxu1  ;;  %v892_v31 = vpop.f32.mrb[7].mxu0 }
 0x11a   :  { %v914_v32 = vpop.f32.mrb[7].mxu1  ;;  %v681_v33 = vadd.f32 %v890_v27, %v641_v22 }
 0x11c   :  { %v721_v35 = vadd.f32 %v912_v28, %v681_v33 }
 0x11e   :  { %v739_v36 = vadd.f32 %v827_v34, %v721_v35 }
 0x120   :  { %740 = vst [vmem:[#allocation3] sm:$0xff] %v739_v36 }
 0x121   :  { %1000 = shalt.err (!%p997_p4)
}
 0x122   :  { %s1001_s18 = scalar_lea.hbm %s1256_s3, 128 }
 0x123   :  { %p1002_p5 = scmp.ne.s32.totalorder %s1256_s3, %s1001_s18  ;;  %p1005_p6 = scmp.lt.u32.totalorder %s1001_s18, %s1256_s3 }
 0x125   :  { %p1007_p7 = pnand %p1005_p6, %p1002_p5 }
 0x127   :  { %1010 = shalt.err (!%p1007_p7)
}
 0x128   :  { %750 = dma.vmem_to_hbm [thread:$0]  %s748_s14, 128, %s1256_s3, [#allocation4]  }
 0x129   :  { %1011 = dma.done.wait [#allocation4], 128  }
 0x12a   :  { %1012 = vsyncadd [#allocation4], 4294967168 }
 0x12b   :  { %754 = vsyncpa [#allocation4], 1 }

</bundles_post_ra>
